<compile_context>
chip_gen: v6e
topology: v6e:2x2x1
jax: 0.10.0
libtpu: 0.0.40
codegen_flags: <defaults>
</compile_context>

<pallas_src>
import functools

import jax
import jax.numpy as jnp
from jax.experimental import pallas as pl
from jax.experimental.pallas import tpu as pltpu

NEG_SLOPE = 0.4
KSIZES = (3, 5, 7, 9)                      # c1, c2, cc2, ccc2
RF = sum(k // 2 for k in KSIZES)           # 10 = cumulative receptive field / side
WINDOW_PAD = 128                           # per-side halo; keeps all slices lane-aligned
W_STRIDE = 128                             # lane stride of each packed weight slab
MAX_ROWS = 4 * max(KSIZES)                 # 36 rows in the tap-stack scratch
assert WINDOW_PAD >= RF and WINDOW_PAD % 128 == 0

_HIGHEST = jax.lax.Precision.HIGHEST


def _leaky_relu(z):
    # max form is valid because NEG_SLOPE < 1.
    return jnp.maximum(z, NEG_SLOPE * z)


def upcon_kernel(width, xc_ref, halo_ref, w_ref, b_ref, o_ref, stack_ref):
    """xc_ref: (4, tile_w) center block; halo_ref: (1, 4, 2*WINDOW_PAD) halos."""
    tile_w = o_ref.shape[-1]
    t_in = stack_ref.shape[-1]

    # Stitch the halo window in VMEM; all splice points are multiples of 128.
    h = jnp.concatenate(
        [halo_ref[0, :, :WINDOW_PAD], xc_ref[...], halo_ref[0, :, WINDOW_PAD:]],
        axis=1)                                                    # (4, t_in)

    # Lanes whose global column falls outside [0, width) must be re-zeroed
    # before every conv: the reference zero-pads each conv at the data edges.
    base = pl.program_id(0) * tile_w - WINDOW_PAD
    gidx = base + jax.lax.broadcasted_iota(jnp.int32, (1, t_in), 1)
    in_domain = (gidx >= 0) & (gidx < width)                       # (1, t_in)

    w_all = w_ref[...]                                             # (4, 5*128)
    b_all = b_ref[...]                                             # (4, 8)

    for l, k in enumerate(KSIZES):
        if l > 0:
            h = jnp.where(in_domain, h, 0.0)   # layer-0 input is already zero there
        pad = k // 2

        def shifted(t, h=h, pad=pad):
            s = t - pad
            return h if s == 0 else pltpu.roll(h, shift=(-s) % t_in, axis=1)

        # Tap stack: row 4*t + i holds h[i, w + t - pad].  Two taps are written
        # per store so the stores are full 8-sublane vregs (one 4-row leftover
        # per layer since K is odd).  The circular wrap of roll only corrupts
        # lanes within RF of the window edges, which are never written out.
        t = 0
        while t + 1 < k:
            stack_ref[4 * t:4 * t + 8, :] = jnp.concatenate(
                [shifted(t), shifted(t + 1)], axis=0)
            t += 2
        stack_ref[4 * t:4 * t + 4, :] = shifted(t)                 # odd leftover tap

        w_l = w_all[:, W_STRIDE * l:W_STRIDE * l + 4 * k]          # aligned (4, 4K)
        z = jnp.dot(w_l, stack_ref[0:4 * k, :],
                    preferred_element_type=jnp.float32,
                    precision=_HIGHEST) + b_all[:, l:l + 1]
        h = _leaky_relu(z) + h                                     # residual add

    # Final 1x1 conv (4 -> 1) + leaky_relu, central tile_w lanes only (aligned).
    h_c = h[:, WINDOW_PAD:WINDOW_PAD + tile_w]
    w5 = w_all[0:1, W_STRIDE * 4:W_STRIDE * 4 + 4]                 # (1, 4)
    z = jnp.dot(w5, h_c, preferred_element_type=jnp.float32,
                precision=_HIGHEST) + b_all[0:1, 4:5]
    o_ref[...] = _leaky_relu(z)


def pack_params(params):
    """Pack conv weights/biases into two small resident arrays.

    w_packed (4, 640): layer l's center-row weights occupy lanes
    [128*l, 128*l + 4*K_l) with column 4*t + i = w[:, i, K//2, t]; the 1x1
    conv's 4 weights sit in row 0 at lanes [512, 516).
    b_packed (4, 8): column l is layer l's bias; b_packed[0, 4] is the 1x1 bias.
    """
    w_packed = jnp.zeros((4, 5 * W_STRIDE), jnp.float32)
    for l, name in enumerate(("c1", "c2", "cc2", "ccc2")):
        w = params[name + "_w"]                       # (4, 4, K, K) OIHW
        k = w.shape[-1]
        wc = w[:, :, k // 2, :]                       # (Cout, Cin, K) center row
        blk = jnp.transpose(wc, (0, 2, 1)).reshape(4, 4 * k)   # col = 4*t + i
        w_packed = w_packed.at[:, W_STRIDE * l:W_STRIDE * l + 4 * k].set(blk)
    w_packed = w_packed.at[0, W_STRIDE * 4:W_STRIDE * 4 + 4].set(
        params["c3_w"].reshape(4))

    b_packed = jnp.zeros((4, 8), jnp.float32)
    for l, name in enumerate(("c1", "c2", "cc2", "ccc2")):
        b_packed = b_packed.at[:, l].set(params[name + "_b"])
    b_packed = b_packed.at[0, 4].set(params["c3_b"][0])
    return w_packed, b_packed


def upcon_forward(x, params, tile_w=None):
    """x: (4, W) float32 -> (1, W) float32 (== torch.squeeze(out, 1))."""
    c, width = x.shape
    assert c == 4

    if tile_w is None:
        # Big tiles amortize per-grid-step overhead; cap at ~W/8 so long inputs
        # keep >= 8 tiles for megacore ("parallel") sharding on v7x.
        tile_w = min(8192, 128 * pl.cdiv(width, 8 * 128))
    tile_w = max(WINDOW_PAD, 128 * pl.cdiv(tile_w, 128))   # mult of 128, >= halo
    assert tile_w % 128 == 0 and tile_w >= WINDOW_PAD

    w_packed, b_packed = pack_params(params)

    n_tiles = pl.cdiv(width, tile_w)
    w_ceil = n_tiles * tile_w
    t_in = tile_w + 2 * WINDOW_PAD
    wp = WINDOW_PAD

    # Non-overlapping center blocks + a small per-tile halo side input; the
    # overlapping window is stitched in VMEM inside the kernel instead of
    # being materialized in HBM.
    xm = jnp.pad(x, ((0, 0), (0, w_ceil - width)))                     # (4, w_ceil)
    xb = xm.reshape(c, n_tiles, tile_w)
    lh = jnp.pad(xb[:, :-1, tile_w - wp:], ((0, 0), (1, 0), (0, 0)))   # left halos
    rh = jnp.pad(xb[:, 1:, :wp], ((0, 0), (0, 1), (0, 0)))             # right halos
    halos = jnp.transpose(jnp.concatenate([lh, rh], axis=2), (1, 0, 2))  # (n,4,2wp)

    out = pl.pallas_call(
        functools.partial(upcon_kernel, width),
        out_shape=jax.ShapeDtypeStruct((1, w_ceil), jnp.float32),
        grid=(n_tiles,),
        in_specs=[
            pl.BlockSpec((4, tile_w), lambda i: (0, i)),           # center (pipelined)
            pl.BlockSpec((1, 4, 2 * wp), lambda i: (i, 0, 0)),     # halos
            pl.BlockSpec((4, 5 * W_STRIDE), lambda i: (0, 0)),     # weights (resident)
            pl.BlockSpec((4, 8), lambda i: (0, 0)),                # biases  (resident)
        ],
        out_specs=pl.BlockSpec((1, tile_w), lambda i: (0, i)),     # lane-dense output
        scratch_shapes=[pltpu.VMEM((MAX_ROWS, t_in), jnp.float32)],
        compiler_params=pltpu.CompilerParams(
            dimension_semantics=("parallel",)),
    )(xm, halos, w_packed, b_packed)
    return out[:, :width]


# ---------------- parameter init (deterministic, torch-default-style) -------
def init_params(key):
    def conv_init(k, cout, cin, ksize):
        fan_in = cin * ksize * ksize
        bound = 1.0 / (fan_in ** 0.5)
        kw, kb = jax.random.split(k)
        w = jax.random.uniform(kw, (cout, cin, ksize, ksize), jnp.float32, -bound, bound)
        b = jax.random.uniform(kb, (cout,), jnp.float32, -bound, bound)
        return w, b

    names_shapes = (("c1", 4, 4, 3), ("c2", 4, 4, 5), ("cc2", 4, 4, 7),
                    ("ccc2", 4, 4, 9), ("c3", 1, 4, 1))
    keys = jax.random.split(key, len(names_shapes))
    params = {}
    for kk, (name, cout, cin, ksize) in zip(keys, names_shapes):
        w, b = conv_init(kk, cout, cin, ksize)
        params[name + "_w"] = w
        params[name + "_b"] = b
    return params


# ---------------- pure-JAX reference (exact torch semantics) ----------------
def upcon_ref(x, params):
    x4 = x[None, :, None, :]  # (1, 4, 1, W)  NCHW

    def conv(h, w, b, pad):
        y = jax.lax.conv_general_dilated(
            h, w, (1, 1), ((pad, pad), (pad, pad)),
            dimension_numbers=("NCHW", "OIHW", "NCHW"),
            precision=_HIGHEST)
        return y + b[None, :, None, None]

    h = x4
    for name, pad in (("c1", 1), ("c2", 2), ("cc2", 3), ("ccc2", 4)):
        h = _leaky_relu(conv(h, params[name + "_w"], params[name + "_b"], pad)) + h
    h = _leaky_relu(conv(h, params["c3_w"], params["c3_b"], 0))
    return h[0, :, 0, :]  # (1, W)


if __name__ == "__main__":
    key = jax.random.PRNGKey(0)
    kx, kp = jax.random.split(key)
    W = 300   # small, deliberately not a multiple of the tile width
    x = jax.random.normal(kx, (4, W), dtype=jnp.float32)
    params = init_params(kp)

    ref = upcon_ref(x, params)
    # default path (3 tiles of 128) and a single-tile path (exercises n_tiles=1)
    for tw in (None, 512):
        out = jax.block_until_ready(upcon_forward(x, params, tile_w=tw))
        assert out.shape == (1, W)
        err = float(jnp.max(jnp.abs(out - ref)))
        assert err < 1e-3, f"tile_w={tw}: max abs err {err}"
    print("KERNEL_OK")
</pallas_src>

<mosaic_0001>
module attributes {stable_mosaic.version = 11 : i64} {
  func.func @upcon_kernel(%arg0: i32, %arg1: memref<4x128xf32, #tpu.memory_space<vmem>>, %arg2: memref<1x4x256xf32, #tpu.memory_space<vmem>>, %arg3: memref<4x640xf32, #tpu.memory_space<vmem>>, %arg4: memref<4x8xf32, #tpu.memory_space<vmem>>, %arg5: memref<1x128xf32, #tpu.memory_space<vmem>>, %arg6: memref<36x384xf32, #tpu.memory_space<vmem>>) attributes {dimension_semantics = [#tpu.dimension_semantics<parallel>], iteration_bounds = array<i64: 3>, scalar_prefetch = 0 : i64, scratch_operands = 1 : i64, tpu.core_type = #tpu.core_type<tc>, window_params = [{transform_indices = @transform_0, window_bounds = array<i64: 4, 128>}, {transform_indices = @transform_1, window_bounds = array<i64: 1, 4, 256>}, {pipeline_mode = #tpu.pipeline_mode<synchronous>, transform_indices = @transform_2, window_bounds = array<i64: 4, 640>}, {pipeline_mode = #tpu.pipeline_mode<synchronous>, transform_indices = @transform_3, window_bounds = array<i64: 4, 8>}, {transform_indices = @transform_4, window_bounds = array<i64: 1, 128>}]} {
    %c0 = arith.constant 0 : index
    %c0_0 = arith.constant 0 : index
    %c0_1 = arith.constant 0 : index
    %0 = vector.load %arg2[%c0, %c0_0, %c0_1] : memref<1x4x256xf32, #tpu.memory_space<vmem>>, vector<1x4x128xf32>
    %1 = vector.shape_cast %0 : vector<1x4x128xf32> to vector<4x128xf32>
    %c0_2 = arith.constant 0 : index
    %c0_3 = arith.constant 0 : index
    %2 = vector.load %arg1[%c0_2, %c0_3] : memref<4x128xf32, #tpu.memory_space<vmem>>, vector<4x128xf32>
    %c0_4 = arith.constant 0 : index
    %c0_5 = arith.constant 0 : index
    %c128 = arith.constant 128 : index
    %3 = vector.load %arg2[%c0_4, %c0_5, %c128] : memref<1x4x256xf32, #tpu.memory_space<vmem>>, vector<1x4x128xf32>
    %4 = vector.shape_cast %3 : vector<1x4x128xf32> to vector<4x128xf32>
    %5 = tpu.concatenate %1, %2, %4 in 1 : vector<4x128xf32>, vector<4x128xf32>, vector<4x128xf32> -> vector<4x384xf32>
    %c128_i32 = arith.constant 128 : i32
    %6 = arith.muli %arg0, %c128_i32 : i32
    %c128_i32_6 = arith.constant 128 : i32
    %7 = arith.subi %6, %c128_i32_6 : i32
    %8 = tpu.iota {dimensions = array<i32: 1>} : vector<1x384xi32>
    %9 = vector.broadcast %7 : i32 to vector<1x384xi32>
    %10 = arith.addi %9, %8 : vector<1x384xi32>
    %c0_i32 = arith.constant 0 : i32
    %11 = vector.broadcast %c0_i32 : i32 to vector<1x384xi32>
    %12 = arith.cmpi sge, %10, %11 : vector<1x384xi32>
    %c300_i32 = arith.constant 300 : i32
    %13 = vector.broadcast %c300_i32 : i32 to vector<1x384xi32>
    %14 = arith.cmpi slt, %10, %13 : vector<1x384xi32>
    %15 = arith.andi %12, %14 : vector<1x384xi1>
    %c0_7 = arith.constant 0 : index
    %c0_8 = arith.constant 0 : index
    %16 = vector.load %arg3[%c0_7, %c0_8] : memref<4x640xf32, #tpu.memory_space<vmem>>, vector<4x640xf32>
    %c0_9 = arith.constant 0 : index
    %c0_10 = arith.constant 0 : index
    %17 = vector.load %arg4[%c0_9, %c0_10] : memref<4x8xf32, #tpu.memory_space<vmem>>, vector<4x8xf32>
    %c1_i32 = arith.constant 1 : i32
    %18 = tpu.dynamic_rotate %5 by %c1_i32 dim 1 : vector<4x384xf32>, i32 -> vector<4x384xf32>
    %19 = tpu.concatenate %18, %5 in 0 : vector<4x384xf32>, vector<4x384xf32> -> vector<8x384xf32>
    %c0_11 = arith.constant 0 : index
    %c0_12 = arith.constant 0 : index
    %20 = vector.load %arg6[%c0_11, %c0_12] : memref<36x384xf32, #tpu.memory_space<vmem>>, vector<8x384xf32>
    tpu.vector_store %arg6[%c0_11, %c0_12], %19 {strides = array<i32>} : memref<36x384xf32, #tpu.memory_space<vmem>>, vector<8x384xf32>,
    %c383_i32 = arith.constant 383 : i32
    %21 = tpu.dynamic_rotate %5 by %c383_i32 dim 1 : vector<4x384xf32>, i32 -> vector<4x384xf32>
    %c8 = arith.constant 8 : index
    %c0_13 = arith.constant 0 : index
    %22 = vector.load %arg6[%c8, %c0_13] : memref<36x384xf32, #tpu.memory_space<vmem>>, vector<4x384xf32>
    tpu.vector_store %arg6[%c8, %c0_13], %21 {strides = array<i32>} : memref<36x384xf32, #tpu.memory_space<vmem>>, vector<4x384xf32>,
    %23 = vector.extract_strided_slice %16 {offsets = [0, 0], sizes = [4, 12], strides = [1, 1]} : vector<4x640xf32> to vector<4x12xf32>
    %c0_14 = arith.constant 0 : index
    %c0_15 = arith.constant 0 : index
    %24 = vector.load %arg6[%c0_14, %c0_15] : memref<36x384xf32, #tpu.memory_space<vmem>>, vector<12x384xf32>
    %cst = arith.constant dense<0.000000e+00> : vector<4x384xf32>
    %25 = tpu.matmul %23, %24, %cst {dimension_numbers = #tpu.dot_dimension_numbers<[1], [0], [0], [1], [0, 0, 1, 1], [], []>, precision = #tpu.contract_precision<fp32>} : vector<4x12xf32>, vector<12x384xf32>, vector<4x384xf32> -> vector<4x384xf32>
    %26 = vector.extract_strided_slice %17 {offsets = [0, 0], sizes = [4, 1], strides = [1, 1]} : vector<4x8xf32> to vector<4x1xf32>
    %27 = vector.broadcast %26 : vector<4x1xf32> to vector<4x384xf32>
    %28 = arith.addf %25, %27 : vector<4x384xf32>
    %cst_16 = arith.constant 4.000000e-01 : f32
    %29 = vector.broadcast %cst_16 : f32 to vector<4x384xf32>
    %30 = arith.mulf %29, %28 : vector<4x384xf32>
    %31 = arith.maximumf %28, %30 : vector<4x384xf32>
    %32 = arith.addf %31, %5 : vector<4x384xf32>
    %cst_17 = arith.constant 0.000000e+00 : f32
    %33 = vector.shape_cast %15 : vector<1x384xi1> to vector<1x384xi1>
    %34 = vector.broadcast %33 : vector<1x384xi1> to vector<4x384xi1>
    %35 = vector.broadcast %cst_17 : f32 to vector<4x384xf32>
    %36 = arith.select %34, %32, %35 : vector<4x384xi1>, vector<4x384xf32>
    %c2_i32 = arith.constant 2 : i32
    %37 = tpu.dynamic_rotate %36 by %c2_i32 dim 1 : vector<4x384xf32>, i32 -> vector<4x384xf32>
    %c1_i32_18 = arith.constant 1 : i32
    %38 = tpu.dynamic_rotate %36 by %c1_i32_18 dim 1 : vector<4x384xf32>, i32 -> vector<4x384xf32>
    %39 = tpu.concatenate %37, %38 in 0 : vector<4x384xf32>, vector<4x384xf32> -> vector<8x384xf32>
    %c0_19 = arith.constant 0 : index
    %c0_20 = arith.constant 0 : index
    %40 = vector.load %arg6[%c0_19, %c0_20] : memref<36x384xf32, #tpu.memory_space<vmem>>, vector<8x384xf32>
    tpu.vector_store %arg6[%c0_19, %c0_20], %39 {strides = array<i32>} : memref<36x384xf32, #tpu.memory_space<vmem>>, vector<8x384xf32>,
    %c383_i32_21 = arith.constant 383 : i32
    %41 = tpu.dynamic_rotate %36 by %c383_i32_21 dim 1 : vector<4x384xf32>, i32 -> vector<4x384xf32>
    %42 = tpu.concatenate %36, %41 in 0 : vector<4x384xf32>, vector<4x384xf32> -> vector<8x384xf32>
    %c8_22 = arith.constant 8 : index
    %c0_23 = arith.constant 0 : index
    %43 = vector.load %arg6[%c8_22, %c0_23] : memref<36x384xf32, #tpu.memory_space<vmem>>, vector<8x384xf32>
    tpu.vector_store %arg6[%c8_22, %c0_23], %42 {strides = array<i32>} : memref<36x384xf32, #tpu.memory_space<vmem>>, vector<8x384xf32>,
    %c382_i32 = arith.constant 382 : i32
    %44 = tpu.dynamic_rotate %36 by %c382_i32 dim 1 : vector<4x384xf32>, i32 -> vector<4x384xf32>
    %c16 = arith.constant 16 : index
    %c0_24 = arith.constant 0 : index
    %45 = vector.load %arg6[%c16, %c0_24] : memref<36x384xf32, #tpu.memory_space<vmem>>, vector<4x384xf32>
    tpu.vector_store %arg6[%c16, %c0_24], %44 {strides = array<i32>} : memref<36x384xf32, #tpu.memory_space<vmem>>, vector<4x384xf32>,
    %46 = vector.extract_strided_slice %16 {offsets = [0, 128], sizes = [4, 20], strides = [1, 1]} : vector<4x640xf32> to vector<4x20xf32>
    %c0_25 = arith.constant 0 : index
    %c0_26 = arith.constant 0 : index
    %47 = vector.load %arg6[%c0_25, %c0_26] : memref<36x384xf32, #tpu.memory_space<vmem>>, vector<20x384xf32>
    %cst_27 = arith.constant dense<0.000000e+00> : vector<4x384xf32>
    %48 = tpu.matmul %46, %47, %cst_27 {dimension_numbers = #tpu.dot_dimension_numbers<[1], [0], [0], [1], [0, 0, 1, 1], [], []>, precision = #tpu.contract_precision<fp32>} : vector<4x20xf32>, vector<20x384xf32>, vector<4x384xf32> -> vector<4x384xf32>
    %49 = vector.extract_strided_slice %17 {offsets = [0, 1], sizes = [4, 1], strides = [1, 1]} : vector<4x8xf32> to vector<4x1xf32>
    %50 = vector.broadcast %49 : vector<4x1xf32> to vector<4x384xf32>
    %51 = arith.addf %48, %50 : vector<4x384xf32>
    %cst_28 = arith.constant 4.000000e-01 : f32
    %52 = vector.broadcast %cst_28 : f32 to vector<4x384xf32>
    %53 = arith.mulf %52, %51 : vector<4x384xf32>
    %54 = arith.maximumf %51, %53 : vector<4x384xf32>
    %55 = arith.addf %54, %36 : vector<4x384xf32>
    %cst_29 = arith.constant 0.000000e+00 : f32
    %56 = vector.shape_cast %15 : vector<1x384xi1> to vector<1x384xi1>
    %57 = vector.broadcast %56 : vector<1x384xi1> to vector<4x384xi1>
    %58 = vector.broadcast %cst_29 : f32 to vector<4x384xf32>
    %59 = arith.select %57, %55, %58 : vector<4x384xi1>, vector<4x384xf32>
    %c3_i32 = arith.constant 3 : i32
    %60 = tpu.dynamic_rotate %59 by %c3_i32 dim 1 : vector<4x384xf32>, i32 -> vector<4x384xf32>
    %c2_i32_30 = arith.constant 2 : i32
    %61 = tpu.dynamic_rotate %59 by %c2_i32_30 dim 1 : vector<4x384xf32>, i32 -> vector<4x384xf32>
    %62 = tpu.concatenate %60, %61 in 0 : vector<4x384xf32>, vector<4x384xf32> -> vector<8x384xf32>
    %c0_31 = arith.constant 0 : index
    %c0_32 = arith.constant 0 : index
    %63 = vector.load %arg6[%c0_31, %c0_32] : memref<36x384xf32, #tpu.memory_space<vmem>>, vector<8x384xf32>
    tpu.vector_store %arg6[%c0_31, %c0_32], %62 {strides = array<i32>} : memref<36x384xf32, #tpu.memory_space<vmem>>, vector<8x384xf32>,
    %c1_i32_33 = arith.constant 1 : i32
    %64 = tpu.dynamic_rotate %59 by %c1_i32_33 dim 1 : vector<4x384xf32>, i32 -> vector<4x384xf32>
    %65 = tpu.concatenate %64, %59 in 0 : vector<4x384xf32>, vector<4x384xf32> -> vector<8x384xf32>
    %c8_34 = arith.constant 8 : index
    %c0_35 = arith.constant 0 : index
    %66 = vector.load %arg6[%c8_34, %c0_35] : memref<36x384xf32, #tpu.memory_space<vmem>>, vector<8x384xf32>
    tpu.vector_store %arg6[%c8_34, %c0_35], %65 {strides = array<i32>} : memref<36x384xf32, #tpu.memory_space<vmem>>, vector<8x384xf32>,
    %c383_i32_36 = arith.constant 383 : i32
    %67 = tpu.dynamic_rotate %59 by %c383_i32_36 dim 1 : vector<4x384xf32>, i32 -> vector<4x384xf32>
    %c382_i32_37 = arith.constant 382 : i32
    %68 = tpu.dynamic_rotate %59 by %c382_i32_37 dim 1 : vector<4x384xf32>, i32 -> vector<4x384xf32>
    %69 = tpu.concatenate %67, %68 in 0 : vector<4x384xf32>, vector<4x384xf32> -> vector<8x384xf32>
    %c16_38 = arith.constant 16 : index
    %c0_39 = arith.constant 0 : index
    %70 = vector.load %arg6[%c16_38, %c0_39] : memref<36x384xf32, #tpu.memory_space<vmem>>, vector<8x384xf32>
    tpu.vector_store %arg6[%c16_38, %c0_39], %69 {strides = array<i32>} : memref<36x384xf32, #tpu.memory_space<vmem>>, vector<8x384xf32>,
    %c381_i32 = arith.constant 381 : i32
    %71 = tpu.dynamic_rotate %59 by %c381_i32 dim 1 : vector<4x384xf32>, i32 -> vector<4x384xf32>
    %c24 = arith.constant 24 : index
    %c0_40 = arith.constant 0 : index
    %72 = vector.load %arg6[%c24, %c0_40] : memref<36x384xf32, #tpu.memory_space<vmem>>, vector<4x384xf32>
    tpu.vector_store %arg6[%c24, %c0_40], %71 {strides = array<i32>} : memref<36x384xf32, #tpu.memory_space<vmem>>, vector<4x384xf32>,
    %73 = vector.extract_strided_slice %16 {offsets = [0, 256], sizes = [4, 28], strides = [1, 1]} : vector<4x640xf32> to vector<4x28xf32>
    %c0_41 = arith.constant 0 : index
    %c0_42 = arith.constant 0 : index
    %74 = vector.load %arg6[%c0_41, %c0_42] : memref<36x384xf32, #tpu.memory_space<vmem>>, vector<28x384xf32>
    %cst_43 = arith.constant dense<0.000000e+00> : vector<4x384xf32>
    %75 = tpu.matmul %73, %74, %cst_43 {dimension_numbers = #tpu.dot_dimension_numbers<[1], [0], [0], [1], [0, 0, 1, 1], [], []>, precision = #tpu.contract_precision<fp32>} : vector<4x28xf32>, vector<28x384xf32>, vector<4x384xf32> -> vector<4x384xf32>
    %76 = vector.extract_strided_slice %17 {offsets = [0, 2], sizes = [4, 1], strides = [1, 1]} : vector<4x8xf32> to vector<4x1xf32>
    %77 = vector.broadcast %76 : vector<4x1xf32> to vector<4x384xf32>
    %78 = arith.addf %75, %77 : vector<4x384xf32>
    %cst_44 = arith.constant 4.000000e-01 : f32
    %79 = vector.broadcast %cst_44 : f32 to vector<4x384xf32>
    %80 = arith.mulf %79, %78 : vector<4x384xf32>
    %81 = arith.maximumf %78, %80 : vector<4x384xf32>
    %82 = arith.addf %81, %59 : vector<4x384xf32>
    %cst_45 = arith.constant 0.000000e+00 : f32
    %83 = vector.shape_cast %15 : vector<1x384xi1> to vector<1x384xi1>
    %84 = vector.broadcast %83 : vector<1x384xi1> to vector<4x384xi1>
    %85 = vector.broadcast %cst_45 : f32 to vector<4x384xf32>
    %86 = arith.select %84, %82, %85 : vector<4x384xi1>, vector<4x384xf32>
    %c4_i32 = arith.constant 4 : i32
    %87 = tpu.dynamic_rotate %86 by %c4_i32 dim 1 : vector<4x384xf32>, i32 -> vector<4x384xf32>
    %c3_i32_46 = arith.constant 3 : i32
    %88 = tpu.dynamic_rotate %86 by %c3_i32_46 dim 1 : vector<4x384xf32>, i32 -> vector<4x384xf32>
    %89 = tpu.concatenate %87, %88 in 0 : vector<4x384xf32>, vector<4x384xf32> -> vector<8x384xf32>
    %c0_47 = arith.constant 0 : index
    %c0_48 = arith.constant 0 : index
    %90 = vector.load %arg6[%c0_47, %c0_48] : memref<36x384xf32, #tpu.memory_space<vmem>>, vector<8x384xf32>
    tpu.vector_store %arg6[%c0_47, %c0_48], %89 {strides = array<i32>} : memref<36x384xf32, #tpu.memory_space<vmem>>, vector<8x384xf32>,
    %c2_i32_49 = arith.constant 2 : i32
    %91 = tpu.dynamic_rotate %86 by %c2_i32_49 dim 1 : vector<4x384xf32>, i32 -> vector<4x384xf32>
    %c1_i32_50 = arith.constant 1 : i32
    %92 = tpu.dynamic_rotate %86 by %c1_i32_50 dim 1 : vector<4x384xf32>, i32 -> vector<4x384xf32>
    %93 = tpu.concatenate %91, %92 in 0 : vector<4x384xf32>, vector<4x384xf32> -> vector<8x384xf32>
    %c8_51 = arith.constant 8 : index
    %c0_52 = arith.constant 0 : index
    %94 = vector.load %arg6[%c8_51, %c0_52] : memref<36x384xf32, #tpu.memory_space<vmem>>, vector<8x384xf32>
    tpu.vector_store %arg6[%c8_51, %c0_52], %93 {strides = array<i32>} : memref<36x384xf32, #tpu.memory_space<vmem>>, vector<8x384xf32>,
    %c383_i32_53 = arith.constant 383 : i32
    %95 = tpu.dynamic_rotate %86 by %c383_i32_53 dim 1 : vector<4x384xf32>, i32 -> vector<4x384xf32>
    %96 = tpu.concatenate %86, %95 in 0 : vector<4x384xf32>, vector<4x384xf32> -> vector<8x384xf32>
    %c16_54 = arith.constant 16 : index
    %c0_55 = arith.constant 0 : index
    %97 = vector.load %arg6[%c16_54, %c0_55] : memref<36x384xf32, #tpu.memory_space<vmem>>, vector<8x384xf32>
    tpu.vector_store %arg6[%c16_54, %c0_55], %96 {strides = array<i32>} : memref<36x384xf32, #tpu.memory_space<vmem>>, vector<8x384xf32>,
    %c382_i32_56 = arith.constant 382 : i32
    %98 = tpu.dynamic_rotate %86 by %c382_i32_56 dim 1 : vector<4x384xf32>, i32 -> vector<4x384xf32>
    %c381_i32_57 = arith.constant 381 : i32
    %99 = tpu.dynamic_rotate %86 by %c381_i32_57 dim 1 : vector<4x384xf32>, i32 -> vector<4x384xf32>
    %100 = tpu.concatenate %98, %99 in 0 : vector<4x384xf32>, vector<4x384xf32> -> vector<8x384xf32>
    %c24_58 = arith.constant 24 : index
    %c0_59 = arith.constant 0 : index
    %101 = vector.load %arg6[%c24_58, %c0_59] : memref<36x384xf32, #tpu.memory_space<vmem>>, vector<8x384xf32>
    tpu.vector_store %arg6[%c24_58, %c0_59], %100 {strides = array<i32>} : memref<36x384xf32, #tpu.memory_space<vmem>>, vector<8x384xf32>,
    %c380_i32 = arith.constant 380 : i32
    %102 = tpu.dynamic_rotate %86 by %c380_i32 dim 1 : vector<4x384xf32>, i32 -> vector<4x384xf32>
    %c32 = arith.constant 32 : index
    %c0_60 = arith.constant 0 : index
    %103 = vector.load %arg6[%c32, %c0_60] : memref<36x384xf32, #tpu.memory_space<vmem>>, vector<4x384xf32>
    tpu.vector_store %arg6[%c32, %c0_60], %102 {strides = array<i32>} : memref<36x384xf32, #tpu.memory_space<vmem>>, vector<4x384xf32>,
    %104 = vector.extract_strided_slice %16 {offsets = [0, 384], sizes = [4, 36], strides = [1, 1]} : vector<4x640xf32> to vector<4x36xf32>
    %c0_61 = arith.constant 0 : index
    %c0_62 = arith.constant 0 : index
    %105 = vector.load %arg6[%c0_61, %c0_62] : memref<36x384xf32, #tpu.memory_space<vmem>>, vector<36x384xf32>
    %cst_63 = arith.constant dense<0.000000e+00> : vector<4x384xf32>
    %106 = tpu.matmul %104, %105, %cst_63 {dimension_numbers = #tpu.dot_dimension_numbers<[1], [0], [0], [1], [0, 0, 1, 1], [], []>, precision = #tpu.contract_precision<fp32>} : vector<4x36xf32>, vector<36x384xf32>, vector<4x384xf32> -> vector<4x384xf32>
    %107 = vector.extract_strided_slice %17 {offsets = [0, 3], sizes = [4, 1], strides = [1, 1]} : vector<4x8xf32> to vector<4x1xf32>
    %108 = vector.broadcast %107 : vector<4x1xf32> to vector<4x384xf32>
    %109 = arith.addf %106, %108 : vector<4x384xf32>
    %cst_64 = arith.constant 4.000000e-01 : f32
    %110 = vector.broadcast %cst_64 : f32 to vector<4x384xf32>
    %111 = arith.mulf %110, %109 : vector<4x384xf32>
    %112 = arith.maximumf %109, %111 : vector<4x384xf32>
    %113 = arith.addf %112, %86 : vector<4x384xf32>
    %114 = vector.extract_strided_slice %113 {offsets = [0, 128], sizes = [4, 128], strides = [1, 1]} : vector<4x384xf32> to vector<4x128xf32>
    %115 = vector.extract_strided_slice %16 {offsets = [0, 512], sizes = [1, 4], strides = [1, 1]} : vector<4x640xf32> to vector<1x4xf32>
    %cst_65 = arith.constant dense<0.000000e+00> : vector<1x128xf32>
    %116 = tpu.matmul %115, %114, %cst_65 {dimension_numbers = #tpu.dot_dimension_numbers<[1], [0], [0], [1], [0, 0, 1, 1], [], []>, precision = #tpu.contract_precision<fp32>} : vector<1x4xf32>, vector<4x128xf32>, vector<1x128xf32> -> vector<1x128xf32>
    %117 = vector.extract_strided_slice %17 {offsets = [0, 4], sizes = [1, 1], strides = [1, 1]} : vector<4x8xf32> to vector<1x1xf32>
    %118 = vector.broadcast %117 : vector<1x1xf32> to vector<1x128xf32>
    %119 = arith.addf %116, %118 : vector<1x128xf32>
    %cst_66 = arith.constant 4.000000e-01 : f32
    %120 = vector.broadcast %cst_66 : f32 to vector<1x128xf32>
    %121 = arith.mulf %120, %119 : vector<1x128xf32>
    %122 = arith.maximumf %119, %121 : vector<1x128xf32>
    %c0_67 = arith.constant 0 : index
    %c0_68 = arith.constant 0 : index
    %123 = vector.load %arg5[%c0_67, %c0_68] : memref<1x128xf32, #tpu.memory_space<vmem>>, vector<1x128xf32>
    tpu.vector_store %arg5[%c0_67, %c0_68], %122 {strides = array<i32>} : memref<1x128xf32, #tpu.memory_space<vmem>>, vector<1x128xf32>,
    return
  }
  func.func @transform_0(%arg0: i32) -> (i32, i32) {
    %c0_i32 = arith.constant 0 : i32
    %c0_i32_0 = arith.constant 0 : i32
    return %c0_i32, %arg0 : i32, i32
  }
  func.func @transform_1(%arg0: i32) -> (i32, i32, i32) {
    %c0_i32 = arith.constant 0 : i32
    %c0_i32_0 = arith.constant 0 : i32
    %c0_i32_1 = arith.constant 0 : i32
    return %arg0, %c0_i32, %c0_i32_0 : i32, i32, i32
  }
  func.func @transform_2(%arg0: i32) -> (i32, i32) {
    %c0_i32 = arith.constant 0 : i32
    %c0_i32_0 = arith.constant 0 : i32
    %c0_i32_1 = arith.constant 0 : i32
    return %c0_i32, %c0_i32_0 : i32, i32
  }
  func.func @transform_3(%arg0: i32) -> (i32, i32) {
    %c0_i32 = arith.constant 0 : i32
    %c0_i32_0 = arith.constant 0 : i32
    %c0_i32_1 = arith.constant 0 : i32
    return %c0_i32, %c0_i32_0 : i32, i32
  }
  func.func @transform_4(%arg0: i32) -> (i32, i32) {
    %c0_i32 = arith.constant 0 : i32
    %c0_i32_0 = arith.constant 0 : i32
    return %c0_i32, %arg0 : i32, i32
  }
}

</mosaic_0001>

<bundles_post_ra>
// kernel: tpu_custom_call.1
= control target key start
LH: loop header
LB: loop body
LE: loop exit
PB: predicated region body
PF: predicated region fallthrough
CT: control target
= control target key end

     0   :  { %s6722_s0 = inlined_call_operand.hbm [shape: f32[4,384], index: 0, kind: input, shape index: {}]   ;;  %s6723_s1 = inlined_call_operand.hbm [shape: f32[3,4,256], index: 1, kind: input, shape index: {}]   ;;  %s6724_s2 = inlined_call_operand.hbm [shape: f32[4,640], index: 2, kind: input, shape index: {}]   ;;  %s6725_s3 = inlined_call_operand.vmem [shape: f32[4,8], index: 3, kind: input, shape index: {}]   ;;  %s6726_s4 = inlined_call_operand.hbm [shape: f32[1,384], index: 4, kind: output, shape index: {}]  }
   0x1   :  { %6731 = sst [smem:[#allocation14_spill]] %s6722_s0 }
   0x2   :  { %9 = vsyncpa [#allocation4], 0 }
   0x3   :  { %11 = vsyncpa [#allocation4 + $0x1], 0 }
   0x4   :  { %12 = vsyncpa [#allocation7], 0 }
   0x5   :  { %14 = vsyncpa [#allocation7 + $0x1], 0 }
   0x6   :  { %15 = vsyncpa [#allocation5], 0 }
   0x7   :  { %17 = vsyncpa [#allocation5 + $0x1], 0  ;;  %s5469_s15 = smov 0   ;;  %s5471_s16 = smov 0  }
   0x8   :  { %s5473_s17 = smov 0   ;;  %s5475_s18 = smov 0  }
   0x9 LB: > { %s5490_s19 = sadd.s32 4294967295, %s5423_s18   ;;  %s4888_s20 = sadd.s32 4294967294, %s5423_s18   ;;  %s5423_s18 = sphi %s5475_s18, %s6755_s18   ;;  %s5419_s17 = sphi %s5473_s17, %s6754_s17   ;;  %s5415_s16 = sphi %s5471_s16, %s6753_s16   ;;  %s5411_s15 = sphi %s5469_s15, %s6752_s15  }
   0xa   : > { %s5494_s21 = sadd.s32 1, %s5423_s18   ;;  %s30_s22 = sadd.s32 1, %s5419_s17 }
   0xb   : > { %s27_s23 = ssub.s32 %s5423_s18, %s5494_s21  ;;  %p37_p0 = scmp.ne.s32.totalorder %s5419_s17, %s5415_s16 }
   0xc   : > { %p28_p1 = scmp.eq.s32.totalorder %s27_s23, 0  ;;  %p43_p2 = scmp.ne.s32.totalorder %s5415_s16, %s5411_s15 }
   0xd   : > { %p6730_p3 = scmp.eq.s32.totalorder %s5490_s19, 0  ;;  %p135_p4 = scmp.eq.s32.totalorder %s5490_s19, 2 }
   0xe   : > { %s5506_s24 = scalar_select %p28_p1, %s5419_s17, %s30_s22  }
   0xf   : > { %p5510_p5 = por %p6730_p3, %p43_p2  ;;  %p5517_p6 = por %p135_p4, %p37_p0 }
  0x10   : > { %p141_p7 = scmp.eq.s32.totalorder %s4888_s20, 2  ;;  %p4889_p8 = scmp.ge.s32.totalorder %s5423_s18, 1 }
  0x11   : > { %s6732_s25 = scalar_select %p5510_p5, 1, 0 }
  0x12   : > { %s6733_s26 = scalar_select %p5517_p6, 1, 0 }
  0x13   : > { %p148_p9 = scmp.lt.s32.totalorder %s5423_s18, 4  ;;  %p5523_p10 = por %p141_p7, %p43_p2 }
  0x14   : > { %s5425_s29 = smov [#allocation8]   ;;  %p38_p13 = scmp.eq.s32.totalorder %s5423_s18, 0 }
  0x15   : > { %s6734_s27 = scalar_select %p5523_p10, 1, 0 }
  0x16   : > { %p5527_p11 = pnand %p4889_p8, %p148_p9  ;;  %s161_s30 = sshll.u32 %s5425_s29, 4  ;;  %s162_s30 = int_to_ptr.vmem [resolvable:$true] %s161_s30 }
  0x17   : > { %s5536_s5 = sand.u32 1, %s5419_s17   ;;  %p5543_p4 = por %p38_p13, %p37_p0 }
  0x18   : > { %s6735_s28 = scalar_select %p5527_p11, 1, 0 }
  0x19   : > { %p5193_p12 = pneg %p5527_p11  ;;  %s4892_s7 = sshll.u32 %s5536_s5, 2 }
  0x1a   : > { %s5280_s8 = scalar_lea.vmem %s162_s30, 320  ;;  %p5288_p6 = scmp.lt.s32.totalorder %s162_s30, %s162_s30 }
  0x1b   : > { %p5194_p2 = pnand %p5193_p12, %p6730_p3  ;;  %p5281_p8 = scmp.ne.s32.totalorder %s162_s30, %s5280_s8 }
  0x1c   : > { %p5289_p5 = scmp.lt.s32.totalorder %s5280_s8, %s5280_s8 }
  0x1d   : > { %p5271_p7 = pneg %p5194_p2 }
  0x1e   : > { %p5290_p11 = por %p5289_p5, %p5288_p6 }
  0x1f   : > { %p5283_p9 = pnand %p5281_p8, %p5271_p7 }
  0x21   : > { %p5284_p10 = pneg %p5283_p9 }
  0x23   : > { %p5291_p1 = pnand %p5290_p11, %p5284_p10 }
  0x25   : > { %5294 = shalt.err (!%p5291_p1)
}
  0x26   : > { %5196 = dma.hbm_to_vmem [thread:$0]  (!%p5194_p2), %s6724_s2, 320, %s162_s30, [#allocation7]  }
  0x27   : > { %s4893_s11 = sshll.u32 %s5423_s18, 6  ;;  %s179_s12 = scalar_lea.vmem [#allocation3], %s4892_s7 }
  0x28   : > { %s186_s13 = sshll.u32 %s179_s12, 4  ;;  %s6737_s0 = sld [smem:[#allocation14_spill]]  ;;  %s5557_s13 = int_to_ptr.vmem [resolvable:$true] %s186_s13 }
  0x29   : > { %p6738_p0 = scmp.lt.s32.totalorder %s5423_s18, 3  ;;  %s193_s29 = sand.u32 1, %s5423_s18  }
  0x2a   : > { %s4894_s30 = sshll.u32 %s5536_s5, 3  ;;  %s176_s7 = scalar_lea.sflag [#allocation4], %s5536_s5 }
  0x2b   : > { %p5563_p5 = pnand %p6738_p0, %p5543_p4 }
  0x2d   : > { %p5297_p10 = pneg %p5563_p5 }
  0x2e   : > { %s5555_s22 = scalar_lea.hbm %s6737_s0, %s4893_s11  ;;  %s5300_s10 = scalar_lea.hbm %s6737_s0, 192 }
  0x2f   : > { %s5295_s8 = scalar_lea.hbm %s5555_s22, 64  ;;  %p5301_p13 = scmp.lt.s32.totalorder %s5555_s22, %s6737_s0 }
  0x30   : > { %p5296_p6 = scmp.ne.s32.totalorder %s5555_s22, %s5295_s8  ;;  %p5302_p1 = scmp.lt.s32.totalorder %s5300_s10, %s5295_s8 }
  0x32   : > { %p5298_p11 = pnand %p5297_p10, %p5296_p6  ;;  %p5303_p2 = por %p5302_p1, %p5301_p13 }
  0x34   : > { %p5299_p12 = pneg %p5298_p11 }
  0x36   : > { %p5304_p4 = pnand %p5303_p2, %p5299_p12 }
  0x38   : > { %5307 = shalt.err (!%p5304_p4)
}
  0x39   : > { %s5308_s5 = scalar_lea.vmem %s5557_s13, 64  ;;  %s5426_s14 = smov [#allocation3]  }
  0x3a   : > { %p5309_p7 = scmp.ne.s32.totalorder %s5557_s13, %s5308_s5  ;;  %s5313_s20 = sshll.u32 %s5426_s14, 4  ;;  %s5314_s20 = int_to_ptr.vmem [resolvable:$false] %s5313_s20 }
  0x3b   : > { %s5315_s9 = scalar_lea.vmem %s5314_s20, 128  ;;  %p5316_p0 = scmp.lt.s32.totalorder %s5557_s13, %s5314_s20 }
  0x3c   : > { %p5311_p8 = pnand %p5309_p7, %p5297_p10  ;;  %p5317_p6 = scmp.lt.s32.totalorder %s5315_s9, %s5308_s5 }
  0x3e   : > { %p5312_p9 = pneg %p5311_p8  ;;  %p5318_p11 = por %p5317_p6, %p5316_p0 }
  0x40   : > { %p5319_p13 = pnand %p5318_p11, %p5312_p9 }
  0x42   : > { %5322 = shalt.err (!%p5319_p13)
}
  0x43   : > { %5200 = dma.hbm_to_vmem [thread:$0]  (!%p5563_p5), %s5555_s22, 64, %s5557_s13, %s176_s7  }
  0x44   : > { %s4906_s8 = sshll.u32 %s5423_s18, 7  ;;  %s197_s6 = scalar_lea.vmem [#allocation6], %s4894_s30 }
  0x45   : > { %s205_s10 = sshll.u32 %s197_s6, 4  ;;  %s203_s14 = scalar_lea.hbm %s6723_s1, %s4906_s8  ;;  %s206_s10 = int_to_ptr.vmem [resolvable:$true] %s205_s10 }
  0x46   : > { %s194_s5 = scalar_lea.sflag [#allocation7], %s193_s29  ;;  %s5323_s20 = scalar_lea.hbm %s203_s14, 128 }
  0x47   : > { %p5324_p12 = scmp.ne.s32.totalorder %s203_s14, %s5323_s20  ;;  %s5328_s13 = scalar_lea.hbm %s6723_s1, 384 }
  0x48   : > { %p5329_p4 = scmp.lt.s32.totalorder %s203_s14, %s6723_s1  ;;  %p5330_p7 = scmp.lt.s32.totalorder %s5328_s13, %s5323_s20 }
  0x49   : > { %p5326_p1 = pnand %p5324_p12, %p5297_p10 }
  0x4a   : > { %p5331_p8 = por %p5330_p7, %p5329_p4 }
  0x4b   : > { %p5327_p2 = pneg %p5326_p1 }
  0x4d   : > { %p5332_p9 = pnand %p5331_p8, %p5327_p2 }
  0x4f   : > { %5335 = shalt.err (!%p5332_p9)
}
  0x50   : > { %s5336_s7 = scalar_lea.vmem %s206_s10, 128  ;;  %s5427_s29 = smov [#allocation6]  }
  0x51   : > { %p5337_p0 = scmp.ne.s32.totalorder %s206_s10, %s5336_s7  ;;  %s5341_s8 = sshll.u32 %s5427_s29, 4  ;;  %s5342_s8 = int_to_ptr.vmem [resolvable:$false] %s5341_s8 }
  0x52   : > { %s5343_s0 = scalar_lea.vmem %s5342_s8, 256  ;;  %p5344_p13 = scmp.lt.s32.totalorder %s206_s10, %s5342_s8 }
  0x53   : > { %p5339_p6 = pnand %p5337_p0, %p5297_p10  ;;  %p5345_p12 = scmp.lt.s32.totalorder %s5343_s0, %s5336_s7 }
  0x55   : > { %p5340_p11 = pneg %p5339_p6  ;;  %p5346_p1 = por %p5345_p12, %p5344_p13 }
  0x57   : > { %p5347_p3 = pnand %p5346_p1, %p5340_p11 }
  0x59   : > { %5350 = shalt.err (!%p5347_p3)
}
  0x5a   : > { %5203 = dma.hbm_to_vmem [thread:$0]  (!%p5563_p5), %s203_s14, 128, %s206_s10, %s194_s5  }
  0x5b   : > { %p6740_p2 = scmp.ne.s32.totalorder %s6735_s28, 0 }
  0x5c   : > { %s5617_s6 = sand.u32 (!%p6740_p2), 1, %s5415_s16   ;;  %p6741_p10 = scmp.ne.s32.totalorder (!%p6740_p2), %s6732_s25, 0 }
  0x5d   : > { %214 = sbr.rel (%p6740_p2) target bundleno = 1868 (0x74c), region = 36  ;;  %s4898_s11 = sshll.u32 (!%p6740_p2), %s5617_s6, 2 }
  0x5e   : > { %s217_s12 = scalar_lea.sflag (!%p6740_p2), [#allocation4], %s5617_s6  ;;  %s220_s20 = scalar_lea.vmem (!%p6740_p2), [#allocation3], %s4898_s11 }
  0x62   : > { %5394 = dma.done.wait (%p6741_p10), %s217_s12, 64  }
  0x63   : > { %5396 = vsyncadd (%p6741_p10), %s217_s12, 4294967232  ;;  %s225_s23 = sand.u32 1, %s5490_s19   ;;  %s4899_s28 = sshll.u32 %s5617_s6, 3 }
  0x64   : > { %s226_s10 = scalar_lea.sflag [#allocation7], %s225_s23  ;;  %s229_s14 = scalar_lea.vmem [#allocation6], %s4899_s28 }
  0x65   : > { %5398 = dma.done.wait (%p6741_p10), %s226_s10, 128  }
  0x66   : > { %5400 = vsyncadd (%p6741_p10), %s226_s10, 4294967168  ;;  %p6742_p3 = scmp.eq.s32.totalorder %s5490_s19, 0 }
  0x68   : > { %5402 = dma.done.wait (%p6742_p3), [#allocation7], 320   ;;  %p6743_p5 = pmov %p6742_p3 }
  0x69   : > { %v5635_v0 = vld [vmem:[%s220_s20] sm:$0xf]  ;;  %v5637_v1 = vld [vmem:[%s229_s14] sm:$0xf]  ;;  %s5428_s5 = smov 127   ;;  %s5429_s25 = smov 1   ;;  %v267_v6 = vlaneseq }
  0x6a   : > { %5404 = vsyncadd (%p6743_p5), [#allocation7], 4294966976  ;;  %316 = vrot.lane.b32.xlu0 %v5635_v0, %s5428_s5  ;;  %314 = vrot.lane.b32.xlu1 %v5637_v1, %s5428_s5  ;;  %v5643_v2 = vld [vmem:[%s229_s14 + $0x4] sm:$0xf]  ;;  %v5430_v3 = vmov 0.0   ;;  %v5431_v5 = vmov 0  }
  0x6b   : > { %419 = vmatprep.mubr.f32.mxu0 %v5430_v3  ;;  %515 = vmatprep.mubr.f32.mxu1 %v5430_v3  ;;  %v5658_v4 = vld [vmem:[%s6725_s3] sm:$0xf]  ;;  %v5661_v7 = vand.u32 127, %v267_v6  ;;  %v5663_v8 = vld [vmem:[#allocation8] sm:$0xff]  ;;  %vm338_vm0 = vcmask 97280   ;;  %v302_v19 = vrot.slane %v5635_v0, 4 }
  0x6c   : > { %5260 = vset.pattern.permute.xlu0 %v5431_v5  ;;  %v340_v9 = vsel %vm338_vm0, %v5663_v8, 0  ;;  %v301_v20 = vrot.slane %v5637_v1, 4  ;;  %vm307_vm3 = vcmask 1043456   ;;  %v303_v47 = vrot.slane %v5643_v2, 4  ;;  %s4901_s22 = sshll.u32 %s5490_s19, 7  ;;  %s5433_s7 = smov 126  }
  0x6d   : > { %vm320_vm1 = vcmp.lt.s32.totalorder %v5661_v7, 127  ;;  %v5669_v13 = vand.u32 4294901760, %v340_v9  ;;  %vm294_vm2 = vcmp.lt.s32.totalorder %v5661_v7, 1  ;;  %vm5432_vm4 = vmmov 0   ;;  %s4902_s30 = sadd.s32 4294967168, %s4901_s22  ;;  %s5434_s29 = smov 2  }
  0x6e   : > { %318 = vrot.lane.b32.xlu0 %v5643_v2, %s5428_s5  ;;  %288 = vrot.lane.b32.xlu1 %v5637_v1, %s5429_s25  ;;  %vm1383_vm14 = vcmp.lt.s32.totalorder %v5661_v7, 126  ;;  %vm1404_vm15 = vcmask 162816   ;;  %vm1325_vm0 = vcmp.lt.s32.totalorder %v5661_v7, 2  ;;  %s5436_s8 = smov 125   ;;  %s5437_s0 = smov 3  }
  0x6f   : > { %v5676_v18 = vsub.f32 %v340_v9, %v5669_v13  ;;  %s5439_s11 = smov 124   ;;  %s5440_s12 = smov 4  }
  0x70   : > { %s4903_s28 = sshll.u32 %s5490_s19, 4  ;;  %s261_s10 = scalar_lea.vmem [#allocation9], %s5617_s6 }
  0x71   : > { %v5686_v26 = vand.u32 4294901760, %v5676_v18  ;;  %s4790_s14 = sshll.u32 %s261_s10, 4  ;;  %s4788_s9 = scalar_lea.hbm %s6726_s4, %s4903_s28  ;;  %s4791_s14 = int_to_ptr.vmem [resolvable:$true] %s4790_s14 }
  0x72   : > { %290 = vrot.lane.b32.xlu0 %v5635_v0, %s5429_s25  ;;  %292 = vrot.lane.b32.xlu1 %v5643_v2, %s5429_s25  ;;  %s4778_s13 = scalar_lea.sflag [#allocation5], %s5617_s6  ;;  %s5351_s22 = scalar_lea.vmem %s4791_s14, 16 }
  0x73   : > { %v423_v34 = vsub.f32 %v5676_v18, %v5686_v26  ;;  %p5352_p4 = scmp.ne.s32.totalorder %s4791_s14, %s5351_s22  ;;  %p6750_p7 = scmp.ne.s32.totalorder %s6733_s26, 0 }
  0x75   : > { %v424_v41 = vand.u32 4294901760, %v423_v34  ;;  %v269_v34 = vadd.s32 128, %v5661_v7  ;;  %p5353_p8 = pnand %p5352_p4, %p6750_p7 }
  0x76   : > { %335 = vperm.xlu0 %5260, %v5658_v4  }
  0x77   : > { %p5354_p9 = pneg %p5353_p8 }
  0xdc   : > { %v317_v10 = vpop.permute.xlu0 %316  ;;  %v315_v11 = vpop.permute.xlu1 %314 }
  0xdd   : > { %v322_v12 = vsel %vm320_vm1, %v315_v11, %v317_v10 }
  0xde   : > { %324 = vst [vmem:[#allocation2 + $0x18] sm:$0xf] %v322_v12 }
  0xe0   : > { %v319_v14 = vpop.permute.xlu0 %318  ;;  %v289_v15 = vpop.permute.xlu1 %288 }
  0xe1   : > { %v321_v16 = vsel %vm320_vm1, %v317_v10, %v319_v14  ;;  %v323_v17 = vsel %vm320_vm1, %v319_v14, %v315_v11 }
  0xe2   : > { %325 = vst [vmem:[#allocation2 + $0x50] sm:$0xf] %v321_v16  ;;  %326 = vst [vmem:[#allocation2 + $0x68] sm:$0xf] %v323_v17 }
  0xe4   : > { %v291_v21 = vpop.permute.xlu0 %290  ;;  %v293_v22 = vpop.permute.xlu1 %292 }
  0xe5   : > { %v296_v23 = vsel %vm294_vm2, %v289_v15, %v291_v21  ;;  %v297_v24 = vsel %vm294_vm2, %v293_v22, %v289_v15  ;;  %v330_v25 = vld [vmem:[#allocation2 + $0x18] sm:$0xf]  ;;  %v295_v49 = vsel %vm294_vm2, %v291_v21, %v293_v22 }
  0xe6   : > { %v309_v27 = vsel %vm307_vm3, %v296_v23, %v302_v19  ;;  %v308_v28 = vsel %vm307_vm3, %v297_v24, %v301_v20  ;;  %v343_v29 = vsel %vm307_vm3, %v330_v25, 0  ;;  %v310_v55 = vsel %vm307_vm3, %v295_v49, %v303_v47 }
  0xe7   : > { %v5691_v30 = vand.u32 4294901760, %v343_v29  ;;  %v5693_v31 = vand.u32 4294901760, %v309_v27  ;;  %v5695_v32 = vand.u32 4294901760, %v308_v28  ;;  %v874_v60 = vand.u32 4294901760, %v310_v55 }
  0xe9   : > { %v331_v33 = vld [vmem:[#allocation2 + $0x50] sm:$0xf]  ;;  %v466_v35 = vsub.f32 %v343_v29, %v5691_v30  ;;  %v472_v36 = vsub.f32 %v309_v27, %v5693_v31  ;;  %v478_v38 = vsub.f32 %v308_v28, %v5695_v32  ;;  %v332_v46 = vld [vmem:[#allocation2 + $0x68] sm:$0xf]  ;;  %v956_v62 = vsub.f32 %v310_v55, %v874_v60 }
  0xea   : > { %v346_v37 = vsel %vm307_vm3, %v331_v33, 0  ;;  %v349_v53 = vsel %vm307_vm3, %v332_v46, 0 }
  0xeb   : > { %v379_v39 = vand.u32 4294901760, %v346_v37  ;;  %v467_v40 = vand.u32 4294901760, %v466_v35  ;;  %v473_v43 = vand.u32 4294901760, %v472_v36  ;;  %v479_v44 = vand.u32 4294901760, %v478_v38 }
  0xec   : > { %v5713_v58 = vand.u32 4294901760, %v349_v53  ;;  %v957_v5 = vand.u32 4294901760, %v956_v62 }
  0xed   : > { %380 = vmatprep.subr.mxu0 %v379_v39  ;;  %v460_v42 = vsub.f32 %v346_v37, %v379_v39  ;;  %v468_v48 = vsub.f32 %v466_v35, %v467_v40  ;;  %v474_v51 = vsub.f32 %v472_v36, %v473_v43  ;;  %v480_v52 = vsub.f32 %v478_v38, %v479_v44 }
  0xee   : > { %382 = vmatpush1.msra.mxu0 %v5691_v30  ;;  %v949_v61 = vsub.f32 %v349_v53, %v5713_v58  ;;  %v958_v9 = vsub.f32 %v956_v62, %v957_v5 }
  0xef   : > { %384 = vmatprep.subr.mxu0 %v5693_v31  ;;  %v461_v45 = vand.u32 4294901760, %v460_v42  ;;  %v469_v56 = vand.u32 4294901760, %v468_v48  ;;  %v475_v57 = vand.u32 4294901760, %v474_v51  ;;  %v481_v59 = vand.u32 4294901760, %v480_v52 }
  0xf0   : > { %386 = vmatpush1.msra.mxu0 %v5695_v32  ;;  %v950_v63 = vand.u32 4294901760, %v949_v61  ;;  %v959_v11 = vand.u32 4294901760, %v958_v9 }
  0xf1   : > { %425 = vmatmul.mubr.f32.vlgmr.msra.gmra.mxu0 %v424_v41  ;;  %553 = vmatprep.subr.mxu0 %v460_v42  ;;  %v462_v50 = vsub.f32 %v460_v42, %v461_v45  ;;  %v336_v15 = vpop.permute.xlu0 %335 }
  0xf2   : > { %556 = vmatpush1.msra.mxu0 %v466_v35  ;;  %595 = vmatprep.mubr.f32.mxu0 %v5430_v3  ;;  %v951_v6 = vsub.f32 %v949_v61, %v950_v63 }
  0xf3   : > { %v463_v54 = vand.u32 4294901760, %v462_v50  ;;  %559 = vmatprep.subr.mxu0 %v472_v36 }
  0xf4   : > { %562 = vmatpush1.msra.mxu0 %v478_v38  ;;  %v952_v10 = vand.u32 4294901760, %v951_v6 }
  0xf5   : > { %464 = vmatprep.subr.mxu1 %v463_v54  ;;  %598 = vmatmul.mubr.f32.vlgmr.msra.gmra.mxu0 %v5676_v18 }
  0xf6   : > { %470 = vmatpush1.msra.mxu1 %v469_v56  ;;  %713 = vmatprep.subr.mxu0 %v461_v45 }
  0xf7   : > { %717 = vmatpush1.msra.mxu0 %v467_v40  ;;  %476 = vmatprep.subr.mxu1 %v475_v57 }
  0xf8   : > { %721 = vmatprep.subr.mxu0 %v473_v43  ;;  %482 = vmatpush1.msra.mxu1 %v481_v59 }
  0xf9   : > { %725 = vmatpush1.msra.mxu0 %v479_v44  ;;  %758 = vmatprep.mubr.f32.mxu0 %v5430_v3 }
  0xfa   : > { %517 = vmatmul.mubr.f32.vlgmr.msra.gmra.mxu1 %v5669_v13  ;;  %633 = vmatprep.subr.mxu1 %v379_v39 }
  0xfb   : > { %760 = vmatmul.mubr.f32.vlgmr.msra.gmra.mxu0 %v5669_v13  ;;  %4991 = vmatprep.subr.mxu0 %v5430_v3 }
  0xfc   : > { %635 = vmatpush1.msra.mxu1 %v5691_v30  ;;  %4992 = vmatpush3.msra.mxu0 %v5713_v58 }
  0xfd   : > { %637 = vmatprep.subr.mxu1 %v5693_v31  ;;  %4993 = vmatprep.subr.mxu0 %v5430_v3 }
  0xfe   : > { %639 = vmatpush1.msra.mxu1 %v5695_v32  ;;  %672 = vmatprep.mubr.f32.mxu1 %v5430_v3 }
  0xff   : > { %4994 = vmatpush3.msra.mxu0 %v874_v60  ;;  %4995 = vmatprep.mubr.msk.f32.mxu0 %vm5432_vm4, %v5430_v3 }
 0x100   : > { %676 = vmatmul.mubr.f32.vlgmr.msra.gmra.mxu1 %v5686_v26  ;;  %795 = vmatprep.subr.mxu1 %v379_v39 }
 0x101   : > { %4996 = vmatmul.mubr.f32.vlgmr.msra.gmra.mxu0 %v424_v41  ;;  %5005 = vmatprep.subr.mxu0 %v5430_v3 }
 0x102   : > { %797 = vmatpush1.msra.mxu1 %v5691_v30  ;;  %5006 = vmatpush3.msra.mxu0 %v949_v61  ;;  %v271_v30 = vstv %s4902_s30  ;;  %s5443_s30 = smov [#allocation9]  }
 0x103   : > { %799 = vmatprep.subr.mxu1 %v5693_v31  ;;  %5007 = vmatprep.subr.mxu0 %v5430_v3  ;;  %v272_v36 = vadd.s32 %v271_v30, %v5661_v7  ;;  %v273_v40 = vadd.s32 %v271_v30, %v269_v34 }
 0x104   : > { %801 = vmatpush1.msra.mxu1 %v5695_v32  ;;  %834 = vmatprep.mubr.f32.mxu1 %v5430_v3 }
 0x105   : > { %5008 = vmatpush3.msra.mxu0 %v956_v62  ;;  %836 = vmatmul.mubr.f32.vlgmr.msra.gmra.mxu1 %v5669_v13  ;;  %vm275_vm5 = vcmp.ge.s32.totalorder %v272_v36, 0  ;;  %vm278_vm6 = vcmp.lt.s32.totalorder %v272_v36, 300  ;;  %vm276_vm8 = vcmp.ge.s32.totalorder %v273_v40, 0  ;;  %vm279_vm9 = vcmp.lt.s32.totalorder %v273_v40, 300 }
 0x106   : > { %4998 = vmatprep.subr.mxu1 %v5430_v3  ;;  %5009 = vmatprep.mubr.msk.f32.mxu0 %vm5432_vm4, %v5430_v3  ;;  %vm5766_vm7 = vmand %vm275_vm5, %vm278_vm6  ;;  %vm2514_vm5 = vcmp.lt.s32.totalorder %v5661_v7, 125  ;;  %vm2537_vm6 = vcmask 228352  }
 0x107   : > { %5019 = vmatprep.subr.mxu0 %v5430_v3  ;;  %4999 = vmatpush3.msra.mxu1 %v952_v10  ;;  %vm5776_vm10 = vmand %vm276_vm8, %vm279_vm9  ;;  %vm2423_vm8 = vcmp.lt.s32.totalorder %v5661_v7, 3  ;;  %vm3742_vm9 = vcmask 293888  }
 0x108   : > { %5010 = vmatmul.mubr.f32.vlgmr.msra.gmra.mxu0 %v5676_v18  ;;  %5000 = vmatprep.subr.mxu1 %v5430_v3 }
 0x109   : > { %5020 = vmatpush3.msra.mxu0 %v950_v63  ;;  %5001 = vmatpush3.msra.mxu1 %v959_v11 }
 0x10a   : > { %5021 = vmatprep.subr.mxu0 %v5430_v3  ;;  %5002 = vmatprep.mubr.msk.f32.mxu1 %vm5432_vm4, %v5430_v3 }
 0x10b   : > { %5022 = vmatpush3.msra.mxu0 %v957_v5  ;;  %5003 = vmatmul.mubr.f32.vlgmr.msra.gmra.mxu1 %v5669_v13 }
 0x10c   : > { %5012 = vmatprep.subr.mxu1 %v5430_v3  ;;  %5016 = vmatprep.mubr.msk.f32.mxu1 %vm5432_vm4, %v5430_v3 }
 0x10d   : > { %5013 = vmatpush3.msra.mxu1 %v5713_v58  ;;  %5023 = vmatprep.mubr.msk.f32.mxu0 %vm5432_vm4, %v5430_v3 }
 0x10e   : > { %5014 = vmatprep.subr.mxu1 %v5430_v3  ;;  %5024 = vmatmul.mubr.f32.vlgmr.msra.gmra.mxu0 %v5669_v13 }
 0x10f   : > { %5015 = vmatpush3.msra.mxu1 %v874_v60  ;;  %1486 = vmatprep.mubr.f32.mxu0 %v5430_v3 }
 0x110   : > { %5017 = vmatmul.mubr.f32.vlgmr.msra.gmra.mxu1 %v5686_v26  ;;  %5026 = vmatprep.subr.mxu1 %v5430_v3 }
 0x111   : > { %5027 = vmatpush3.msra.mxu1 %v5713_v58  ;;  %5030 = vmatprep.mubr.msk.f32.mxu1 %vm5432_vm4, %v5430_v3 }
 0x112   : > { %5028 = vmatprep.subr.mxu1 %v5430_v3 }
 0x113   : > { %5029 = vmatpush3.msra.mxu1 %v874_v60 }
 0x114   : > { %5031 = vmatmul.mubr.f32.vlgmr.msra.gmra.mxu1 %v5669_v13 }
 0x115   : > { %1592 = vmatprep.mubr.f32.mxu1 %v5430_v3 }
 0x1b1   : > { %v426_v12 = vpop.f32.mrf.mxu0 }
 0x1b2   : > { %v427_v18 = vadd.f32 %v426_v12, %v336_v15 }
 0x1b3   : > { %v428_v14 = vpop.f32.mrf.mxu0 }
 0x1b4   : > { %v429_v22 = vadd.f32 %v428_v14, %v336_v15 }
 0x1b5   : > { %v599_v16 = vpop.f32.mrf.mxu0 }
 0x1b7   : > { %v601_v17 = vpop.f32.mrf.mxu0 }
 0x1ba   : > { %v518_v19 = vpop.f32.mrf.mxu1 }
 0x1bb   : > { %v519_v20 = vadd.f32 %v518_v19, %v427_v18  ;;  %v761_v21 = vpop.f32.mrf.mxu0 }
 0x1bc   : > { %v520_v23 = vpop.f32.mrf.mxu1 }
 0x1bd   : > { %v521_v24 = vadd.f32 %v520_v23, %v429_v22  ;;  %v763_v25 = vpop.f32.mrf.mxu0  ;;  %v600_v26 = vadd.f32 %v599_v16, %v519_v20 }
 0x1bf   : > { %v602_v27 = vadd.f32 %v601_v17, %v521_v24 }
 0x1c0   : > { %v677_v13 = vpop.f32.mrf.mxu1 }
 0x1c1   : > { %v678_v28 = vadd.f32 %v677_v13, %v600_v26  ;;  %v915_v29 = vpop.f32.mrf.mxu0 }
 0x1c2   : > { %v679_v31 = vpop.f32.mrf.mxu1  ;;  %v916_v45 = vadd.f32 %v915_v29, %v336_v15  ;;  %v5441_v15 = vmov 3  }
 0x1c3   : > { %v680_v32 = vadd.f32 %v679_v31, %v602_v27  ;;  %v762_v33 = vadd.f32 %v761_v21, %v678_v28  ;;  %v4997_v35 = vpop.f32.mrf.mxu0 }
 0x1c5   : > { %v837_v37 = vpop.f32.mrf.mxu1  ;;  %v764_v38 = vadd.f32 %v763_v25, %v680_v32  ;;  %v1403_v25 = vcombine.high %v5663_v8, %v5663_v8 }
 0x1c6   : > { %v838_v39 = vadd.f32 %v837_v37, %v762_v33 }
 0x1c7   : > { %v839_v41 = vpop.f32.mrf.mxu1  ;;  %v1405_v13 = vsel %vm1404_vm15, %v1403_v25, 0 }
 0x1c8   : > { %v1301_v42 = vmul.f32 0.4, %v838_v39  ;;  %v840_v43 = vadd.f32 %v839_v41, %v764_v38  ;;  %v1072_v44 = vpop.f32.mrf.mxu0  ;;  %v5838_v33 = vand.u32 4294901760, %v1405_v13 }
 0x1ca   : > { %v1304_v46 = vmax.f32 %v838_v39, %v1301_v42  ;;  %v1302_v47 = vmul.f32 0.4, %v840_v43  ;;  %v5011_v48 = vpop.f32.mrf.mxu0  ;;  %v5854_v40 = vsub.f32 %v1405_v13, %v5838_v33 }
 0x1cb   : > { %v996_v50 = vpop.f32.mrf.mxu1 }
 0x1cc   : > { %v1307_v51 = vadd.f32 %v1304_v46, %v5637_v1  ;;  %v1305_v52 = vmax.f32 %v840_v43, %v1302_v47  ;;  %v997_v53 = vadd.f32 %v996_v50, %v916_v45  ;;  %v270_v1 = vadd.s32 256, %v5661_v7 }
 0x1cd   : > { %v5004_v54 = vpop.f32.mrf.mxu1 }
 0x1ce   : > { %v5773_v55 = vsel %vm5766_vm7, %v1307_v51, 0.0  ;;  %v1308_v56 = vadd.f32 %v1305_v52, %v5635_v0  ;;  %v1073_v57 = vadd.f32 %v1072_v44, %v997_v53  ;;  %v1224_v58 = vpop.f32.mrf.mxu0  ;;  %v274_v6 = vadd.s32 %v271_v30, %v270_v1 }
 0x1cf   : > { %1377 = vrot.lane.b32.xlu1 %v5773_v55, %s5433_s7  ;;  %1353 = vrot.lane.b32.xlu0 %v5773_v55, %s5428_s5  ;;  %v5874_v52 = vand.u32 4294901760, %v5854_v40 }
 0x1d0   : > { %v1147_v60 = vpop.f32.mrf.mxu1  ;;  %v5025_v61 = vpop.f32.mrf.mxu0  ;;  %v5787_v0 = vsel %vm5776_vm10, %v1308_v56, 0.0  ;;  %vm277_vm11 = vcmp.ge.s32.totalorder %v274_v6, 0  ;;  %vm280_vm12 = vcmp.lt.s32.totalorder %v274_v6, 300 }
 0x1d1   : > { %v1148_v62 = vadd.f32 %v1147_v60, %v1073_v57  ;;  %vm5797_vm13 = vmand %vm277_vm11, %vm280_vm12  ;;  %v1490_v6 = vsub.f32 %v5854_v40, %v5874_v52 }
 0x1d2   : > { %v5018_v63 = vpop.f32.mrf.mxu1 }
 0x1d3   : > { %v1225_v5 = vadd.f32 %v1224_v58, %v1148_v62  ;;  %1355 = vrot.lane.b32.xlu1 %v5787_v0, %s5428_s5  ;;  %1329 = vrot.lane.b32.xlu0 %v5773_v55, %s5429_s25 }
 0x1d4   : > { %v1297_v9 = vpop.f32.mrf.mxu1 }
 0x1d5   : > { %v1298_v10 = vadd.f32 %v1297_v9, %v1225_v5 }
 0x1d6   : > { %v5032_v11 = vpop.f32.mrf.mxu1 }
 0x1d7   : > { %v1303_v12 = vmul.f32 0.4, %v1298_v10  ;;  %1331 = vrot.lane.b32.xlu1 %v5787_v0, %s5429_s25  ;;  %1379 = vrot.lane.b32.xlu0 %v5787_v0, %s5433_s7 }
 0x1d9   : > { %v1306_v14 = vmax.f32 %v1298_v10, %v1303_v12 }
 0x1db   : > { %v1309_v16 = vadd.f32 %v1306_v14, %v5643_v2  ;;  %v5435_v2 = vmov 1  }
 0x1dc   : > { %5261 = vset.pattern.permute.xlu0 %v5435_v2 }
 0x1dd   : > { %v5804_v17 = vsel %vm5797_vm13, %v1309_v16, 0.0 }
 0x1de   : > { %1357 = vrot.lane.b32.xlu1 %v5804_v17, %s5428_s5  ;;  %1333 = vrot.lane.b32.xlu0 %v5804_v17, %s5429_s25 }
 0x1e2   : > { %1381 = vrot.lane.b32.xlu1 %v5804_v17, %s5433_s7  ;;  %1321 = vrot.lane.b32.xlu0 %v5787_v0, %s5434_s29 }
 0x1e6   : > { %1319 = vrot.lane.b32.xlu1 %v5773_v55, %s5434_s29  ;;  %1400 = vperm.xlu0 %5261, %v5658_v4  }
 0x1ea   : > { %1323 = vrot.lane.b32.xlu1 %v5804_v17, %s5434_s29 }
 0x241   : > { %v1378_v18 = vpop.permute.xlu1 %1377  ;;  %v5819_v19 = vpop.permute.xlu0 %1353 }
 0x245   : > { %v1356_v20 = vpop.permute.xlu1 %1355  ;;  %v1330_v21 = vpop.permute.xlu0 %1329 }
 0x246   : > { %v1360_v26 = vsel %vm320_vm1, %v5819_v19, %v1356_v20 }
 0x247   : > { %v1365_v32 = vrot.slane %v1360_v26, 4 }
 0x249   : > { %v1380_v22 = vpop.permute.xlu0 %1379  ;;  %v5822_v23 = vpop.permute.xlu1 %1331  ;;  %v1371_v39 = vsel %vm307_vm3, %v5773_v55, %v1365_v32 }
 0x24a   : > { %v1385_v24 = vsel %vm1383_vm14, %v1378_v18, %v1380_v22  ;;  %v1336_v34 = vsel %vm294_vm2, %v1330_v21, %v5822_v23  ;;  %v5869_v50 = vand.u32 4294901760, %v1371_v39 }
 0x24b   : > { %1387 = vst [vmem:[#allocation2 + $0x8] sm:$0xf] %v1385_v24  ;;  %v1342_v41 = vrot.slane %v1336_v34, 4 }
 0x24c   : > { %v5885_v62 = vsub.f32 %v1371_v39, %v5869_v50 }
 0x24e   : > { %v1544_v16 = vand.u32 4294901760, %v5885_v62 }
 0x250   : > { %v5831_v27 = vpop.permute.xlu1 %1357  ;;  %v5836_v30 = vpop.permute.xlu0 %1333  ;;  %v1545_v26 = vsub.f32 %v5885_v62, %v1544_v16 }
 0x251   : > { %v1359_v28 = vsel %vm320_vm1, %v1356_v20, %v5831_v27  ;;  %v1337_v45 = vsel %vm294_vm2, %v5836_v30, %v1330_v21  ;;  %v1361_v13 = vsel %vm320_vm1, %v5831_v27, %v5819_v19  ;;  %v1335_v19 = vsel %vm294_vm2, %v5822_v23, %v5836_v30 }
 0x252   : > { %v1366_v29 = vrot.slane %v1359_v28, 4  ;;  %v1396_v31 = vld [vmem:[#allocation2 + $0x8] sm:$0xf]  ;;  %v1341_v53 = vrot.slane %v1337_v45, 4 }
 0x253   : > { %v1408_v37 = vsel %vm307_vm3, %v1396_v31, 0 }
 0x254   : > { %v1382_v8 = vpop.permute.xlu1 %1381  ;;  %v1372_v38 = vsel %vm307_vm3, %v5787_v0, %v1366_v29  ;;  %v5856_v42 = vpop.permute.xlu0 %1321  ;;  %v5858_v44 = vand.u32 4294901760, %v1408_v37 }
 0x255   : > { %v1384_v35 = vsel %vm1383_vm14, %v1380_v22, %v1382_v8  ;;  %v1386_v36 = vsel %vm1383_vm14, %v1382_v8, %v1378_v18  ;;  %v5866_v47 = vand.u32 4294901760, %v1372_v38  ;;  %v5901_v18 = vand.u32 4294901760, %v1490_v6 }
 0x256   : > { %1388 = vst [vmem:[#allocation2 + $0x48] sm:$0xf] %v1384_v35  ;;  %1389 = vst [vmem:[#allocation2 + $0x40] sm:$0xf] %v1386_v36  ;;  %v1531_v56 = vsub.f32 %v1408_v37, %v5858_v44  ;;  %v1367_v35 = vrot.slane %v1361_v13, 4  ;;  %v1546_v36 = vand.u32 4294901760, %v1545_v26 }
 0x257   : > { %v5880_v1 = vsub.f32 %v1372_v38, %v5866_v47 }
 0x258   : > { %v1320_v43 = vpop.permute.xlu1 %1319  ;;  %v1532_v10 = vand.u32 4294901760, %v1531_v56 }
 0x259   : > { %v1327_v46 = vsel %vm1325_vm0, %v1320_v43, %v5856_v42  ;;  %v1538_v12 = vand.u32 4294901760, %v5880_v1 }
 0x25a   : > { %v1348_v48 = vsel %vm307_vm3, %v1327_v46, %v1342_v41  ;;  %v1533_v21 = vsub.f32 %v1531_v56, %v1532_v10  ;;  %v1373_v41 = vsel %vm307_vm3, %v5804_v17, %v1367_v35 }
 0x25b   : > { %v5871_v51 = vand.u32 4294901760, %v1348_v48  ;;  %v1539_v25 = vsub.f32 %v5880_v1, %v1538_v12 }
 0x25c   : > { %v1324_v54 = vpop.permute.xlu1 %1323  ;;  %v1534_v31 = vand.u32 4294901760, %v1533_v21 }
 0x25d   : > { %v1328_v57 = vsel %vm1325_vm0, %v1324_v54, %v1320_v43  ;;  %v1397_v58 = vld [vmem:[#allocation2 + $0x48] sm:$0xf]  ;;  %v1549_v9 = vsub.f32 %v1348_v48, %v5871_v51  ;;  %v1540_v8 = vand.u32 4294901760, %v1539_v25  ;;  %v1398_v34 = vld [vmem:[#allocation2 + $0x40] sm:$0xf]  ;;  %v1326_v39 = vsel %vm1325_vm0, %v5856_v42, %v1324_v54 }
 0x25e   : > { %v1347_v60 = vsel %vm307_vm3, %v1328_v57, %v1341_v53  ;;  %v1411_v61 = vsel %vm307_vm3, %v1397_v58, 0  ;;  %v1414_v38 = vsel %vm307_vm3, %v1398_v34, 0  ;;  %v1343_v43 = vrot.slane %v1335_v19, 4 }
 0x25f   : > { %v5887_v63 = vand.u32 4294901760, %v1411_v61  ;;  %v5889_v5 = vand.u32 4294901760, %v1347_v60  ;;  %v1550_v20 = vand.u32 4294901760, %v1549_v9  ;;  %v5928_v23 = vand.u32 4294901760, %v1414_v38 }
 0x260   : > { %v1349_v30 = vsel %vm307_vm3, %v1326_v39, %v1343_v43  ;;  %v5933_v42 = vand.u32 4294901760, %v1373_v41 }
 0x261   : > { %1443 = vmatprep.subr.mxu0 %v5887_v63  ;;  %v1525_v11 = vsub.f32 %v1411_v61, %v5887_v63  ;;  %v1555_v14 = vsub.f32 %v1347_v60, %v5889_v5  ;;  %v1551_v29 = vsub.f32 %v1549_v9, %v1550_v20  ;;  %v5937_v45 = vand.u32 4294901760, %v1349_v30  ;;  %v1401_v60 = vpop.permute.xlu0 %1400 }
 0x262   : > { %1445 = vmatpush1.msra.mxu0 %v5858_v44  ;;  %v2039_v46 = vsub.f32 %v1414_v38, %v5928_v23  ;;  %v2046_v48 = vsub.f32 %v1373_v41, %v5933_v42 }
 0x263   : > { %1447 = vmatprep.subr.mxu0 %v5866_v47  ;;  %v1526_v2 = vand.u32 4294901760, %v1525_v11  ;;  %v1556_v22 = vand.u32 4294901760, %v1555_v14  ;;  %v1552_v27 = vand.u32 4294901760, %v1551_v29  ;;  %v2053_v54 = vsub.f32 %v1349_v30, %v5937_v45 }
 0x264   : > { %1449 = vmatpush1.msra.mxu0 %v5869_v50  ;;  %v2040_v53 = vand.u32 4294901760, %v2039_v46 }
 0x265   : > { %1451 = vmatprep.subr.mxu0 %v5871_v51  ;;  %v1527_v24 = vsub.f32 %v1525_v11, %v1526_v2  ;;  %v1557_v32 = vsub.f32 %v1555_v14, %v1556_v22  ;;  %v2054_v58 = vand.u32 4294901760, %v2053_v54 }
 0x266   : > { %1453 = vmatpush1.msra.mxu0 %v5889_v5  ;;  %v2041_v57 = vsub.f32 %v2039_v46, %v2040_v53 }
 0x267   : > { %v1528_v28 = vand.u32 4294901760, %v1527_v24  ;;  %1628 = vmatprep.subr.mxu0 %v1525_v11  ;;  %1492 = vmatmul.mubr.f32.vlgmr.msra.gmra.mxu0 %v5901_v18  ;;  %v1558_v37 = vand.u32 4294901760, %v1557_v32 }
 0x268   : > { %1631 = vmatpush1.msra.mxu0 %v1531_v56  ;;  %1676 = vmatprep.mubr.f32.mxu0 %v5430_v3  ;;  %v2047_v56 = vand.u32 4294901760, %v2046_v48 }
 0x269   : > { %1529 = vmatprep.subr.mxu1 %v1528_v28  ;;  %1634 = vmatprep.subr.mxu0 %v5880_v1 }
 0x26a   : > { %1535 = vmatpush1.msra.mxu1 %v1534_v31  ;;  %1637 = vmatpush1.msra.mxu0 %v5885_v62 }
 0x26b   : > { %1541 = vmatprep.subr.mxu1 %v1540_v8  ;;  %1640 = vmatprep.subr.mxu0 %v1549_v9 }
 0x26c   : > { %1547 = vmatpush1.msra.mxu1 %v1546_v36  ;;  %1643 = vmatpush1.msra.mxu0 %v1555_v14 }
 0x26d   : > { %1553 = vmatprep.subr.mxu1 %v1552_v27  ;;  %1794 = vmatprep.subr.mxu0 %v1526_v2 }
 0x26e   : > { %1559 = vmatpush1.msra.mxu1 %v1558_v37  ;;  %1679 = vmatmul.mubr.f32.vlgmr.msra.gmra.mxu0 %v5854_v40 }
 0x26f   : > { %1798 = vmatpush1.msra.mxu0 %v1532_v10  ;;  %1594 = vmatmul.mubr.f32.vlgmr.msra.gmra.mxu1 %v5838_v33 }
 0x270   : > { %1712 = vmatprep.subr.mxu1 %v5887_v63  ;;  %1802 = vmatprep.subr.mxu0 %v1538_v12 }
 0x271   : > { %1714 = vmatpush1.msra.mxu1 %v5858_v44  ;;  %1806 = vmatpush1.msra.mxu0 %v1544_v16 }
 0x272   : > { %1716 = vmatprep.subr.mxu1 %v5866_v47  ;;  %1810 = vmatprep.subr.mxu0 %v1550_v20 }
 0x273   : > { %1718 = vmatpush1.msra.mxu1 %v5869_v50  ;;  %1814 = vmatpush1.msra.mxu0 %v1556_v22 }
 0x274   : > { %1720 = vmatprep.subr.mxu1 %v5871_v51  ;;  %1847 = vmatprep.mubr.f32.mxu0 %v5430_v3 }
 0x275   : > { %5033 = vmatprep.subr.mxu0 %v5430_v3  ;;  %1722 = vmatpush1.msra.mxu1 %v5889_v5 }
 0x276   : > { %1755 = vmatprep.mubr.f32.mxu1 %v5430_v3  ;;  %1849 = vmatmul.mubr.f32.vlgmr.msra.gmra.mxu0 %v5838_v33 }
 0x277   : > { %5034 = vmatpush3.msra.mxu0 %v5928_v23  ;;  %1759 = vmatmul.mubr.f32.vlgmr.msra.gmra.mxu1 %v5874_v52 }
 0x278   : > { %1882 = vmatprep.subr.mxu1 %v5887_v63  ;;  %5035 = vmatprep.subr.mxu0 %v5430_v3 }
 0x279   : > { %1884 = vmatpush1.msra.mxu1 %v5858_v44  ;;  %5036 = vmatpush3.msra.mxu0 %v5933_v42  ;;  %v2048_v44 = vsub.f32 %v2046_v48, %v2047_v56 }
 0x27a   : > { %1886 = vmatprep.subr.mxu1 %v5866_v47  ;;  %5037 = vmatprep.subr.mxu0 %v5430_v3  ;;  %v2042_v47 = vand.u32 4294901760, %v2041_v57 }
 0x27b   : > { %1888 = vmatpush1.msra.mxu1 %v5869_v50  ;;  %5038 = vmatpush3.msra.mxu0 %v5937_v45  ;;  %v2055_v50 = vsub.f32 %v2053_v54, %v2054_v58 }
 0x27c   : > { %5039 = vmatprep.mubr.msk.f32.mxu0 %vm5432_vm4, %v5430_v3  ;;  %1890 = vmatprep.subr.mxu1 %v5871_v51  ;;  %v2049_v51 = vand.u32 4294901760, %v2048_v44 }
 0x27d   : > { %5040 = vmatmul.mubr.f32.vlgmr.msra.gmra.mxu0 %v5901_v18  ;;  %5051 = vmatprep.subr.mxu0 %v5430_v3  ;;  %v2056_v1 = vand.u32 4294901760, %v2055_v50 }
 0x27e   : > { %1892 = vmatpush1.msra.mxu1 %v5889_v5  ;;  %1925 = vmatprep.mubr.f32.mxu1 %v5430_v3 }
 0x27f   : > { %5052 = vmatpush3.msra.mxu0 %v2039_v46  ;;  %1927 = vmatmul.mubr.f32.vlgmr.msra.gmra.mxu1 %v5838_v33 }
 0x280   : > { %5042 = vmatprep.subr.mxu1 %v5430_v3  ;;  %5053 = vmatprep.subr.mxu0 %v5430_v3 }
 0x281   : > { %5043 = vmatpush3.msra.mxu1 %v2042_v47  ;;  %5054 = vmatpush3.msra.mxu0 %v2046_v48 }
 0x282   : > { %5044 = vmatprep.subr.mxu1 %v5430_v3  ;;  %5055 = vmatprep.subr.mxu0 %v5430_v3 }
 0x283   : > { %5045 = vmatpush3.msra.mxu1 %v2049_v51  ;;  %5056 = vmatpush3.msra.mxu0 %v2053_v54 }
 0x284   : > { %5046 = vmatprep.subr.mxu1 %v5430_v3  ;;  %5057 = vmatprep.mubr.msk.f32.mxu0 %vm5432_vm4, %v5430_v3 }
 0x285   : > { %5069 = vmatprep.subr.mxu0 %v5430_v3  ;;  %5047 = vmatpush3.msra.mxu1 %v2056_v1 }
 0x286   : > { %5048 = vmatprep.mubr.msk.f32.mxu1 %vm5432_vm4, %v5430_v3  ;;  %5058 = vmatmul.mubr.f32.vlgmr.msra.gmra.mxu0 %v5854_v40 }
 0x287   : > { %5070 = vmatpush3.msra.mxu0 %v2040_v53  ;;  %5049 = vmatmul.mubr.f32.vlgmr.msra.gmra.mxu1 %v5838_v33 }
 0x288   : > { %5060 = vmatprep.subr.mxu1 %v5430_v3  ;;  %5071 = vmatprep.subr.mxu0 %v5430_v3 }
 0x289   : > { %5061 = vmatpush3.msra.mxu1 %v5928_v23  ;;  %5072 = vmatpush3.msra.mxu0 %v2047_v56 }
 0x28a   : > { %5062 = vmatprep.subr.mxu1 %v5430_v3  ;;  %5073 = vmatprep.subr.mxu0 %v5430_v3 }
 0x28b   : > { %5063 = vmatpush3.msra.mxu1 %v5933_v42  ;;  %5074 = vmatpush3.msra.mxu0 %v2054_v58 }
 0x28c   : > { %5064 = vmatprep.subr.mxu1 %v5430_v3  ;;  %5066 = vmatprep.mubr.msk.f32.mxu1 %vm5432_vm4, %v5430_v3 }
 0x28d   : > { %5065 = vmatpush3.msra.mxu1 %v5937_v45  ;;  %5075 = vmatprep.mubr.msk.f32.mxu0 %vm5432_vm4, %v5430_v3 }
 0x28e   : > { %5067 = vmatmul.mubr.f32.vlgmr.msra.gmra.mxu1 %v5874_v52  ;;  %5078 = vmatprep.subr.mxu1 %v5430_v3 }
 0x28f   : > { %5079 = vmatpush3.msra.mxu1 %v5928_v23  ;;  %5076 = vmatmul.mubr.f32.vlgmr.msra.gmra.mxu0 %v5838_v33 }
 0x290   : > { %5080 = vmatprep.subr.mxu1 %v5430_v3  ;;  %5084 = vmatprep.mubr.msk.f32.mxu1 %vm5432_vm4, %v5430_v3 }
 0x291   : > { %5081 = vmatpush3.msra.mxu1 %v5933_v42  ;;  %2622 = vmatprep.mubr.f32.mxu0 %v5430_v3 }
 0x292   : > { %5082 = vmatprep.subr.mxu1 %v5430_v3 }
 0x293   : > { %5083 = vmatpush3.msra.mxu1 %v5937_v45 }
 0x294   : > { %5085 = vmatmul.mubr.f32.vlgmr.msra.gmra.mxu1 %v5838_v33 }
 0x295   : > { %2738 = vmatprep.mubr.f32.mxu1 %v5430_v3 }
 0x327   : > { %v1493_v40 = vpop.f32.mrf.mxu0 }
 0x328   : > { %v1494_v61 = vadd.f32 %v1493_v40, %v1401_v60 }
 0x329   : > { %v1495_v52 = vpop.f32.mrf.mxu0 }
 0x32a   : > { %v1496_v6 = vadd.f32 %v1495_v52, %v1401_v60 }
 0x32e   : > { %v1680_v62 = vpop.f32.mrf.mxu0 }
 0x32f   : > { %v1595_v63 = vpop.f32.mrf.mxu1 }
 0x330   : > { %v1596_v5 = vadd.f32 %v1595_v63, %v1494_v61  ;;  %v1682_v9 = vpop.f32.mrf.mxu0 }
 0x331   : > { %v1597_v10 = vpop.f32.mrf.mxu1 }
 0x332   : > { %v1598_v11 = vadd.f32 %v1597_v10, %v1496_v6  ;;  %v1681_v12 = vadd.f32 %v1680_v62, %v1596_v5 }
 0x334   : > { %v1683_v20 = vadd.f32 %v1682_v9, %v1598_v11 }
 0x336   : > { %v1850_v14 = vpop.f32.mrf.mxu0 }
 0x337   : > { %v1760_v16 = vpop.f32.mrf.mxu1 }
 0x338   : > { %v1852_v18 = vpop.f32.mrf.mxu0  ;;  %v1761_v33 = vadd.f32 %v1760_v16, %v1681_v12  ;;  %v6071_v12 = vld [vmem:[#allocation8 + $0x8] sm:$0xff] }
 0x339   : > { %v1762_v2 = vpop.f32.mrf.mxu1 }
 0x33a   : > { %v1763_v21 = vadd.f32 %v1762_v2, %v1683_v20  ;;  %v1851_v24 = vadd.f32 %v1850_v14, %v1761_v33 }
 0x33c   : > { %v1853_v13 = vadd.f32 %v1852_v18, %v1763_v21  ;;  %v2539_v18 = vsel %vm2537_vm6, %v6071_v12, 0 }
 0x33d   : > { %v2007_v22 = vpop.f32.mrf.mxu0 }
 0x33e   : > { %v2008_v19 = vadd.f32 %v2007_v22, %v1401_v60 }
 0x33f   : > { %v1928_v25 = vpop.f32.mrf.mxu1  ;;  %v5041_v26 = vpop.f32.mrf.mxu0 }
 0x340   : > { %v1929_v28 = vadd.f32 %v1928_v25, %v1851_v24 }
 0x341   : > { %v1930_v29 = vpop.f32.mrf.mxu1 }
 0x342   : > { %v2405_v31 = vmul.f32 0.4, %v1929_v28  ;;  %v1931_v32 = vadd.f32 %v1930_v29, %v1853_v13 }
 0x344   : > { %v2408_v8 = vmax.f32 %v1929_v28, %v2405_v31  ;;  %v2406_v34 = vmul.f32 0.4, %v1931_v32  ;;  %v6098_v31 = vand.u32 4294901760, %v2539_v18 }
 0x346   : > { %v2411_v35 = vadd.f32 %v2408_v8, %v5773_v55  ;;  %v2171_v36 = vpop.f32.mrf.mxu0  ;;  %v2409_v38 = vmax.f32 %v1931_v32, %v2406_v34 }
 0x347   : > { %v2093_v27 = vpop.f32.mrf.mxu1 }
 0x348   : > { %v6006_v37 = vsel %vm5766_vm7, %v2411_v35, 0.0  ;;  %v5059_v39 = vpop.f32.mrf.mxu0  ;;  %v2094_v41 = vadd.f32 %v2093_v27, %v2008_v19  ;;  %v2412_v55 = vadd.f32 %v2409_v38, %v5787_v0 }
 0x349   : > { %v5050_v43 = vpop.f32.mrf.mxu1  ;;  %2508 = vrot.lane.b32.xlu1 %v6006_v37, %s5436_s8  ;;  %2484 = vrot.lane.b32.xlu0 %v6006_v37, %s5433_s7  ;;  %v2463_v34 = vrot.slane %v6006_v37, 4 }
 0x34a   : > { %v2172_v23 = vadd.f32 %v2171_v36, %v2094_v41  ;;  %v6019_v46 = vsel %vm5776_vm10, %v2412_v55, 0.0 }
 0x34b   : > { %v2464_v28 = vrot.slane %v6019_v46, 4 }
 0x34d   : > { %2427 = vrot.lane.b32.xlu1 %v6006_v37, %s5434_s29  ;;  %2475 = vrot.lane.b32.xlu0 %v6006_v37, %s5428_s5 }
 0x34e   : > { %v2247_v30 = vpop.f32.mrf.mxu1 }
 0x34f   : > { %v2248_v42 = vadd.f32 %v2247_v30, %v2172_v23  ;;  %v2327_v45 = vpop.f32.mrf.mxu0 }
 0x350   : > { %v5068_v48 = vpop.f32.mrf.mxu1 }
 0x351   : > { %v5077_v53 = vpop.f32.mrf.mxu0  ;;  %2451 = vrot.lane.b32.xlu1 %v6006_v37, %s5429_s25  ;;  %2510 = vrot.lane.b32.xlu0 %v6019_v46, %s5436_s8  ;;  %v2328_v0 = vadd.f32 %v2327_v45, %v2248_v42  ;;  %v6121_v42 = vsub.f32 %v2539_v18, %v6098_v31 }
 0x354   : > { %v2401_v54 = vpop.f32.mrf.mxu1 }
 0x355   : > { %v2402_v56 = vadd.f32 %v2401_v54, %v2328_v0  ;;  %2417 = vrot.lane.b32.xlu1 %v6006_v37, %s5437_s0  ;;  %2477 = vrot.lane.b32.xlu0 %v6019_v46, %s5428_s5 }
 0x356   : > { %v5086_v57 = vpop.f32.mrf.mxu1 }
 0x357   : > { %v2407_v58 = vmul.f32 0.4, %v2402_v56 }
 0x359   : > { %v2410_v44 = vmax.f32 %v2402_v56, %v2407_v58  ;;  %2486 = vrot.lane.b32.xlu1 %v6019_v46, %s5433_s7  ;;  %2429 = vrot.lane.b32.xlu0 %v6019_v46, %s5434_s29 }
 0x35b   : > { %v2413_v47 = vadd.f32 %v2410_v44, %v5804_v17  ;;  %v5438_v17 = vmov 2  }
 0x35c   : > { %5262 = vset.pattern.permute.xlu0 %v5438_v17 }
 0x35d   : > { %v6036_v50 = vsel %vm5797_vm13, %v2413_v47, 0.0  ;;  %2453 = vrot.lane.b32.xlu0 %v6019_v46, %s5429_s25 }
 0x35e   : > { %2488 = vrot.lane.b32.xlu1 %v6036_v50, %s5433_s7 }
 0x361   : > { %2455 = vrot.lane.b32.xlu0 %v6036_v50, %s5429_s25 }
 0x362   : > { %2512 = vrot.lane.b32.xlu1 %v6036_v50, %s5436_s8 }
 0x365   : > { %2419 = vrot.lane.b32.xlu0 %v6019_v46, %s5437_s0 }
 0x366   : > { %2479 = vrot.lane.b32.xlu1 %v6036_v50, %s5428_s5 }
 0x369   : > { %2534 = vperm.xlu0 %5262, %v5658_v4  }
 0x36a   : > { %2431 = vrot.lane.b32.xlu1 %v6036_v50, %s5434_s29 }
 0x36d   : > { %5263 = vset.pattern.permute.xlu0 %v5441_v15 }
 0x36e   : > { %2421 = vrot.lane.b32.xlu1 %v6036_v50, %s5437_s0 }
 0x3bb   : > { %v2509_v51 = vpop.permute.xlu1 %2508  ;;  %v6055_v1 = vpop.permute.xlu0 %2484 }
 0x3bf   : > { %v2428_v40 = vpop.permute.xlu1 %2427  ;;  %v6057_v52 = vpop.permute.xlu0 %2475 }
 0x3c3   : > { %v2452_v60 = vpop.permute.xlu1 %2451  ;;  %v2511_v61 = vpop.permute.xlu0 %2510 }
 0x3c4   : > { %v2516_v62 = vsel %vm2514_vm5, %v2509_v51, %v2511_v61 }
 0x3c5   : > { %2518 = vst [vmem:[#allocation2 + $0x20] sm:$0xf] %v2516_v62 }
 0x3c7   : > { %v2418_v63 = vpop.permute.xlu1 %2417  ;;  %v2478_v5 = vpop.permute.xlu0 %2477 }
 0x3c8   : > { %v2482_v13 = vsel %vm320_vm1, %v6057_v52, %v2478_v5 }
 0x3cb   : > { %v2487_v6 = vpop.permute.xlu1 %2486  ;;  %v6062_v9 = vpop.permute.xlu0 %2429 }
 0x3cc   : > { %v2491_v10 = vsel %vm1383_vm14, %v6055_v1, %v2487_v6  ;;  %v2530_v14 = vld [vmem:[#allocation2 + $0x20] sm:$0xf]  ;;  %v2434_v20 = vsel %vm1325_vm0, %v2428_v40, %v6062_v9 }
 0x3cd   : > { %v2496_v16 = vrot.slane %v2491_v10, 4  ;;  %v2542_v21 = vsel %vm307_vm3, %v2530_v14, 0  ;;  %v2440_v8 = vrot.slane %v2434_v20, 4 }
 0x3ce   : > { %v6110_v39 = vand.u32 4294901760, %v2542_v21 }
 0x3cf   : > { %v6064_v4 = vpop.permute.xlu0 %2453  ;;  %v2502_v32 = vsel %vm307_vm3, %v2482_v13, %v2496_v16 }
 0x3d0   : > { %v6069_v11 = vpop.permute.xlu1 %2488  ;;  %v2458_v24 = vsel %vm294_vm2, %v2452_v60, %v6064_v4  ;;  %v6118_v30 = vand.u32 4294901760, %v2502_v32  ;;  %v6130_v0 = vsub.f32 %v2542_v21, %v6110_v39 }
 0x3d1   : > { %v2490_v22 = vsel %vm1383_vm14, %v2487_v6, %v6069_v11  ;;  %v2470_v19 = vsel %vm307_vm3, %v2458_v24, %v2464_v28 }
 0x3d2   : > { %v2497_v36 = vrot.slane %v2490_v22, 4  ;;  %v6125_v48 = vand.u32 4294901760, %v2470_v19  ;;  %v6144_v17 = vsub.f32 %v2502_v32, %v6118_v30  ;;  %v2666_v6 = vand.u32 4294901760, %v6130_v0 }
 0x3d3   : > { %v6073_v2 = vpop.permute.xlu0 %2455 }
 0x3d4   : > { %v2513_v33 = vpop.permute.xlu1 %2512  ;;  %v2459_v29 = vsel %vm294_vm2, %v6073_v2, %v2452_v60 }
 0x3d5   : > { %v2515_v25 = vsel %vm2514_vm5, %v2511_v61, %v2513_v33  ;;  %v2517_v26 = vsel %vm2514_vm5, %v2513_v33, %v2509_v51  ;;  %v2469_v41 = vsel %vm307_vm3, %v2459_v29, %v2463_v34  ;;  %v6147_v51 = vand.u32 4294901760, %v6121_v42 }
 0x3d6   : > { %2519 = vst [vmem:[#allocation2 + $0x10] sm:$0xf] %v2515_v25  ;;  %2520 = vst [vmem:[#allocation2 + $0x38] sm:$0xf] %v2517_v26  ;;  %v6132_v54 = vand.u32 4294901760, %v2469_v41  ;;  %v6152_v61 = vsub.f32 %v2470_v19, %v6125_v48  ;;  %v2678_v33 = vand.u32 4294901760, %v6144_v17  ;;  %v2667_v25 = vsub.f32 %v6130_v0, %v2666_v6 }
 0x3d7   : > { %v6102_v35 = vpop.permute.xlu0 %2419  ;;  %v2626_v21 = vsub.f32 %v6121_v42, %v6147_v51 }
 0x3d8   : > { %v6105_v27 = vpop.permute.xlu1 %2479  ;;  %v2425_v38 = vsel %vm2423_vm8, %v2418_v63, %v6102_v35  ;;  %v2684_v24 = vand.u32 4294901760, %v6152_v61 }
 0x3d9   : > { %v2481_v43 = vsel %vm320_vm1, %v2478_v5, %v6105_v27  ;;  %v2446_v23 = vsel %vm307_vm3, %v2425_v38, %v2440_v8  ;;  %v6157_v5 = vsub.f32 %v2469_v41, %v6132_v54  ;;  %v2679_v8 = vsub.f32 %v6144_v17, %v2678_v33 }
 0x3da   : > { %v2503_v55 = vsel %vm307_vm3, %v2481_v43, %v2497_v36  ;;  %v6137_v58 = vand.u32 4294901760, %v2446_v23  ;;  %v6195_v34 = vand.u32 4294901760, %v2626_v21  ;;  %v2685_v19 = vsub.f32 %v6152_v61, %v2684_v24 }
 0x3db   : > { %v6123_v45 = vand.u32 4294901760, %v2503_v55  ;;  %v2690_v26 = vand.u32 4294901760, %v6157_v5  ;;  %v2668_v41 = vand.u32 4294901760, %v2667_v25  ;;  %v2483_v25 = vsel %vm320_vm1, %v6105_v27, %v6057_v52 }
 0x3dc   : > { %v6127_v53 = vpop.permute.xlu1 %2431  ;;  %v6167_v18 = vsub.f32 %v2446_v23, %v6137_v58  ;;  %v2465_v27 = vrot.slane %v6036_v50, 4 }
 0x3dd   : > { %v2435_v56 = vsel %vm1325_vm0, %v6127_v53, %v2428_v40  ;;  %v2531_v57 = vld [vmem:[#allocation2 + $0x10] sm:$0xf]  ;;  %v6140_v44 = vsub.f32 %v2503_v55, %v6123_v45  ;;  %v2691_v43 = vsub.f32 %v6157_v5, %v2690_v26  ;;  %v2532_v21 = vld [vmem:[#allocation2 + $0x38] sm:$0xf]  ;;  %v2433_v52 = vsel %vm1325_vm0, %v6062_v9, %v6127_v53 }
 0x3de   : > { %v2545_v47 = vsel %vm307_vm3, %v2531_v57, 0  ;;  %v2439_v40 = vrot.slane %v2435_v56, 4  ;;  %v2696_v32 = vand.u32 4294901760, %v6167_v18  ;;  %v2680_v56 = vand.u32 4294901760, %v2679_v8 }
 0x3df   : > { %v6149_v60 = vand.u32 4294901760, %v2545_v47  ;;  %v2672_v16 = vand.u32 4294901760, %v6140_v44  ;;  %v2441_v53 = vrot.slane %v2433_v52, 4 }
 0x3e0   : > { %v6154_v62 = vpop.permute.xlu1 %2421  ;;  %v2697_v23 = vsub.f32 %v6167_v18, %v2696_v32 }
 0x3e1   : > { %v2426_v10 = vsel %vm2423_vm8, %v6154_v62, %v2418_v63  ;;  %2575 = vmatprep.subr.mxu0 %v6149_v60  ;;  %v2659_v14 = vsub.f32 %v2545_v47, %v6149_v60  ;;  %v2673_v29 = vsub.f32 %v6140_v44, %v2672_v16  ;;  %v2686_v47 = vand.u32 4294901760, %v2685_v19 }
 0x3e2   : > { %v2445_v20 = vsel %vm307_vm3, %v2426_v10, %v2439_v40  ;;  %2577 = vmatpush1.msra.mxu0 %v6110_v39  ;;  %v2692_v40 = vand.u32 4294901760, %v2691_v43  ;;  %v2698_v10 = vand.u32 4294901760, %v2697_v23 }
 0x3e3   : > { %2579 = vmatprep.subr.mxu0 %v6123_v45  ;;  %v2660_v63 = vand.u32 4294901760, %v2659_v14  ;;  %v6175_v22 = vand.u32 4294901760, %v2445_v20  ;;  %v2674_v55 = vand.u32 4294901760, %v2673_v29 }
 0x3e4   : > { %2581 = vmatpush1.msra.mxu0 %v6118_v30 }
 0x3e5   : > { %2583 = vmatprep.subr.mxu0 %v6125_v48  ;;  %v2661_v13 = vsub.f32 %v2659_v14, %v2660_v63  ;;  %v6185_v28 = vsub.f32 %v2445_v20, %v6175_v22  ;;  %v2492_v20 = vsel %vm1383_vm14, %v6069_v11, %v6055_v1  ;;  %v2548_v1 = vsel %vm307_vm3, %v2532_v21, 0 }
 0x3e6   : > { %2585 = vmatpush1.msra.mxu0 %v6132_v54  ;;  %v2457_v11 = vsel %vm294_vm2, %v6064_v4, %v6073_v2  ;;  %v2424_v4 = vsel %vm2423_vm8, %v6102_v35, %v6154_v62  ;;  %v6256_v9 = vand.u32 4294901760, %v2548_v1 }
 0x3e7   : > { %2587 = vmatprep.subr.mxu0 %v6137_v58  ;;  %v2662_v36 = vand.u32 4294901760, %v2661_v13  ;;  %v2702_v38 = vand.u32 4294901760, %v6185_v28  ;;  %v2498_v13 = vrot.slane %v2492_v20, 4  ;;  %v2471_v2 = vsel %vm307_vm3, %v2457_v11, %v2465_v27 }
 0x3e8   : > { %2589 = vmatpush1.msra.mxu0 %v6175_v22 }
 0x3e9   : > { %2663 = vmatprep.subr.mxu1 %v2662_v36  ;;  %2772 = vmatprep.subr.mxu0 %v2659_v14  ;;  %v2703_v57 = vsub.f32 %v6185_v28, %v2702_v38 }
 0x3ea   : > { %2669 = vmatpush1.msra.mxu1 %v2668_v41  ;;  %2628 = vmatmul.mubr.f32.vlgmr.msra.gmra.mxu0 %v6195_v34 }
 0x3eb   : > { %2675 = vmatprep.subr.mxu1 %v2674_v55  ;;  %2775 = vmatpush1.msra.mxu0 %v6130_v0  ;;  %v2704_v14 = vand.u32 4294901760, %v2703_v57  ;;  %v2447_v0 = vsel %vm307_vm3, %v2424_v4, %v2441_v53 }
 0x3ec   : > { %2681 = vmatpush1.msra.mxu1 %v2680_v56  ;;  %2778 = vmatprep.subr.mxu0 %v6140_v44  ;;  %v6274_v44 = vsub.f32 %v2548_v1, %v6256_v9  ;;  %v6286_v62 = vand.u32 4294901760, %v2447_v0 }
 0x3ed   : > { %2687 = vmatprep.subr.mxu1 %v2686_v47  ;;  %2781 = vmatpush1.msra.mxu0 %v6144_v17  ;;  %v6276_v17 = vand.u32 4294901760, %v2471_v2 }
 0x3ee   : > { %2693 = vmatpush1.msra.mxu1 %v2692_v40  ;;  %2784 = vmatprep.subr.mxu0 %v6152_v61 }
 0x3ef   : > { %2699 = vmatprep.subr.mxu1 %v2698_v10  ;;  %2787 = vmatpush1.msra.mxu0 %v6157_v5  ;;  %v3212_v5 = vsub.f32 %v2471_v2, %v6276_v17 }
 0x3f0   : > { %2790 = vmatprep.subr.mxu0 %v6167_v18  ;;  %2705 = vmatpush1.msra.mxu1 %v2704_v14 }
 0x3f1   : > { %2793 = vmatpush1.msra.mxu0 %v6185_v28  ;;  %2740 = vmatmul.mubr.f32.vlgmr.msra.gmra.mxu1 %v6098_v31 }
 0x3f2   : > { %2826 = vmatprep.mubr.f32.mxu0 %v5430_v3  ;;  %2860 = vmatprep.subr.mxu1 %v6149_v60 }
 0x3f3   : > { %2944 = vmatprep.subr.mxu0 %v2660_v63  ;;  %2829 = vmatmul.mubr.f32.vlgmr.msra.gmra.mxu0 %v6121_v42  ;;  %v2504_v63 = vsel %vm307_vm3, %v2483_v25, %v2498_v13 }
 0x3f4   : > { %2862 = vmatpush1.msra.mxu1 %v6110_v39  ;;  %2948 = vmatpush1.msra.mxu0 %v2666_v6  ;;  %v6265_v35 = vand.u32 4294901760, %v2504_v63  ;;  %v3199_v6 = vand.u32 4294901760, %v6274_v44 }
 0x3f5   : > { %2864 = vmatprep.subr.mxu1 %v6123_v45  ;;  %2952 = vmatprep.subr.mxu0 %v2672_v16 }
 0x3f6   : > { %2866 = vmatpush1.msra.mxu1 %v6118_v30  ;;  %2956 = vmatpush1.msra.mxu0 %v2678_v33  ;;  %v6284_v61 = vsub.f32 %v2504_v63, %v6265_v35 }
 0x3f7   : > { %2868 = vmatprep.subr.mxu1 %v6125_v48  ;;  %2960 = vmatprep.subr.mxu0 %v2684_v24 }
 0x3f8   : > { %2870 = vmatpush1.msra.mxu1 %v6132_v54  ;;  %2964 = vmatpush1.msra.mxu0 %v2690_v26  ;;  %v3206_v16 = vand.u32 4294901760, %v6284_v61 }
 0x3f9   : > { %2872 = vmatprep.subr.mxu1 %v6137_v58  ;;  %2968 = vmatprep.subr.mxu0 %v2696_v32 }
 0x3fa   : > { %2874 = vmatpush1.msra.mxu1 %v6175_v22  ;;  %2907 = vmatprep.mubr.f32.mxu1 %v5430_v3 }
 0x3fb   : > { %2972 = vmatpush1.msra.mxu0 %v2702_v38  ;;  %2911 = vmatmul.mubr.f32.vlgmr.msra.gmra.mxu1 %v6147_v51 }
 0x3fc   : > { %3005 = vmatprep.mubr.f32.mxu0 %v5430_v3  ;;  %3038 = vmatprep.subr.mxu1 %v6149_v60  ;;  %v3219_v60 = vsub.f32 %v2447_v0, %v6286_v62 }
 0x3fd   : > { %5087 = vmatprep.subr.mxu0 %v5430_v3  ;;  %3007 = vmatmul.mubr.f32.vlgmr.msra.gmra.mxu0 %v6098_v31 }
 0x3fe   : > { %3040 = vmatpush1.msra.mxu1 %v6110_v39  ;;  %5088 = vmatpush3.msra.mxu0 %v6256_v9  ;;  %v3200_v39 = vsub.f32 %v6274_v44, %v3199_v6 }
 0x3ff   : > { %3042 = vmatprep.subr.mxu1 %v6123_v45  ;;  %5089 = vmatprep.subr.mxu0 %v5430_v3  ;;  %v3213_v45 = vand.u32 4294901760, %v3212_v5 }
 0x400   : > { %3044 = vmatpush1.msra.mxu1 %v6118_v30  ;;  %5090 = vmatpush3.msra.mxu0 %v6265_v35  ;;  %v3207_v30 = vsub.f32 %v6284_v61, %v3206_v16 }
 0x401   : > { %3046 = vmatprep.subr.mxu1 %v6125_v48  ;;  %5091 = vmatprep.subr.mxu0 %v5430_v3  ;;  %v3220_v48 = vand.u32 4294901760, %v3219_v60 }
 0x402   : > { %3048 = vmatpush1.msra.mxu1 %v6132_v54  ;;  %5092 = vmatpush3.msra.mxu0 %v6276_v17  ;;  %v3201_v54 = vand.u32 4294901760, %v3200_v39  ;;  %v3208_v18 = vand.u32 4294901760, %v3207_v30 }
 0x403   : > { %3050 = vmatprep.subr.mxu1 %v6137_v58  ;;  %5093 = vmatprep.subr.mxu0 %v5430_v3  ;;  %v3214_v58 = vsub.f32 %v3212_v5, %v3213_v45  ;;  %v3221_v33 = vsub.f32 %v3219_v60, %v3220_v48 }
 0x404   : > { %3052 = vmatpush1.msra.mxu1 %v6175_v22  ;;  %3085 = vmatprep.mubr.f32.mxu1 %v5430_v3 }
 0x405   : > { %5094 = vmatpush3.msra.mxu0 %v6286_v62  ;;  %5095 = vmatprep.mubr.msk.f32.mxu0 %vm5432_vm4, %v5430_v3  ;;  %v3215_v22 = vand.u32 4294901760, %v3214_v58  ;;  %v3222_v24 = vand.u32 4294901760, %v3221_v33 }
 0x406   : > { %3087 = vmatmul.mubr.f32.vlgmr.msra.gmra.mxu1 %v6098_v31  ;;  %5096 = vmatmul.mubr.f32.vlgmr.msra.gmra.mxu0 %v6195_v34 }
 0x407   : > { %5098 = vmatprep.subr.mxu1 %v5430_v3  ;;  %5109 = vmatprep.subr.mxu0 %v5430_v3 }
 0x408   : > { %5099 = vmatpush3.msra.mxu1 %v3201_v54  ;;  %5110 = vmatpush3.msra.mxu0 %v6274_v44 }
 0x409   : > { %5100 = vmatprep.subr.mxu1 %v5430_v3  ;;  %5111 = vmatprep.subr.mxu0 %v5430_v3 }
 0x40a   : > { %5101 = vmatpush3.msra.mxu1 %v3208_v18  ;;  %5112 = vmatpush3.msra.mxu0 %v6284_v61 }
 0x40b   : > { %5102 = vmatprep.subr.mxu1 %v5430_v3  ;;  %5113 = vmatprep.subr.mxu0 %v5430_v3 }
 0x40c   : > { %5103 = vmatpush3.msra.mxu1 %v3215_v22  ;;  %5114 = vmatpush3.msra.mxu0 %v3212_v5 }
 0x40d   : > { %5104 = vmatprep.subr.mxu1 %v5430_v3  ;;  %5115 = vmatprep.subr.mxu0 %v5430_v3 }
 0x40e   : > { %5105 = vmatpush3.msra.mxu1 %v3222_v24  ;;  %5106 = vmatprep.mubr.msk.f32.mxu1 %vm5432_vm4, %v5430_v3 }
 0x40f   : > { %5116 = vmatpush3.msra.mxu0 %v3219_v60  ;;  %5107 = vmatmul.mubr.f32.vlgmr.msra.gmra.mxu1 %v6098_v31 }
 0x410   : > { %5117 = vmatprep.mubr.msk.f32.mxu0 %vm5432_vm4, %v5430_v3  ;;  %5120 = vmatprep.subr.mxu1 %v5430_v3 }
 0x411   : > { %5131 = vmatprep.subr.mxu0 %v5430_v3  ;;  %5118 = vmatmul.mubr.f32.vlgmr.msra.gmra.mxu0 %v6121_v42 }
 0x412   : > { %5121 = vmatpush3.msra.mxu1 %v6256_v9  ;;  %5132 = vmatpush3.msra.mxu0 %v3199_v6 }
 0x413   : > { %5122 = vmatprep.subr.mxu1 %v5430_v3  ;;  %5133 = vmatprep.subr.mxu0 %v5430_v3 }
 0x414   : > { %5123 = vmatpush3.msra.mxu1 %v6265_v35  ;;  %5134 = vmatpush3.msra.mxu0 %v3206_v16 }
 0x415   : > { %5124 = vmatprep.subr.mxu1 %v5430_v3  ;;  %5135 = vmatprep.subr.mxu0 %v5430_v3 }
 0x416   : > { %5125 = vmatpush3.msra.mxu1 %v6276_v17  ;;  %5136 = vmatpush3.msra.mxu0 %v3213_v45 }
 0x417   : > { %5126 = vmatprep.subr.mxu1 %v5430_v3  ;;  %5137 = vmatprep.subr.mxu0 %v5430_v3 }
 0x418   : > { %5127 = vmatpush3.msra.mxu1 %v6286_v62  ;;  %5128 = vmatprep.mubr.msk.f32.mxu1 %vm5432_vm4, %v5430_v3 }
 0x419   : > { %5138 = vmatpush3.msra.mxu0 %v3220_v48  ;;  %5129 = vmatmul.mubr.f32.vlgmr.msra.gmra.mxu1 %v6147_v51  ;;  %v2535_v51 = vpop.permute.xlu0 %2534 }
 0x41a   : > { %5142 = vmatprep.subr.mxu1 %v5430_v3  ;;  %5139 = vmatprep.mubr.msk.f32.mxu0 %vm5432_vm4, %v5430_v3 }
 0x41b   : > { %5143 = vmatpush3.msra.mxu1 %v6256_v9  ;;  %5140 = vmatmul.mubr.f32.vlgmr.msra.gmra.mxu0 %v6098_v31 }
 0x41c   : > { %5144 = vmatprep.subr.mxu1 %v5430_v3  ;;  %5150 = vmatprep.mubr.msk.f32.mxu1 %vm5432_vm4, %v5430_v3 }
 0x41d   : > { %5145 = vmatpush3.msra.mxu1 %v6265_v35  ;;  %3825 = vmatprep.mubr.f32.mxu0 %v5430_v3 }
 0x41e   : > { %5146 = vmatprep.subr.mxu1 %v5430_v3 }
 0x41f   : > { %5147 = vmatpush3.msra.mxu1 %v6276_v17 }
 0x420   : > { %5148 = vmatprep.subr.mxu1 %v5430_v3 }
 0x421   : > { %5149 = vmatpush3.msra.mxu1 %v6286_v62 }
 0x422   : > { %5151 = vmatmul.mubr.f32.vlgmr.msra.gmra.mxu1 %v6098_v31 }
 0x423   : > { %3950 = vmatprep.mubr.f32.mxu1 %v5430_v3 }
 0x4aa   : > { %v2629_v42 = vpop.f32.mrf.mxu0 }
 0x4ab   : > { %v2630_v28 = vadd.f32 %v2629_v42, %v2535_v51 }
 0x4ac   : > { %v2631_v26 = vpop.f32.mrf.mxu0 }
 0x4ad   : > { %v2632_v8 = vadd.f32 %v2631_v26, %v2535_v51 }
 0x4b1   : > { %v2741_v29 = vpop.f32.mrf.mxu1 }
 0x4b2   : > { %v2742_v34 = vadd.f32 %v2741_v29, %v2630_v28 }
 0x4b3   : > { %v2830_v32 = vpop.f32.mrf.mxu0  ;;  %v2743_v36 = vpop.f32.mrf.mxu1 }
 0x4b4   : > { %v2744_v41 = vadd.f32 %v2743_v36, %v2632_v8  ;;  %v2831_v43 = vadd.f32 %v2830_v32, %v2742_v34 }
 0x4b5   : > { %v2832_v19 = vpop.f32.mrf.mxu0 }
 0x4b6   : > { %v2833_v57 = vadd.f32 %v2832_v19, %v2744_v41  ;;  %v3741_v19 = vcombine.high %v6071_v12, %v6071_v12 }
 0x4bb   : > { %v2912_v38 = vpop.f32.mrf.mxu1 }
 0x4bc   : > { %v2913_v23 = vadd.f32 %v2912_v38, %v2831_v43 }
 0x4bd   : > { %v3008_v55 = vpop.f32.mrf.mxu0  ;;  %v2914_v56 = vpop.f32.mrf.mxu1 }
 0x4be   : > { %v2915_v47 = vadd.f32 %v2914_v56, %v2833_v57  ;;  %v3009_v40 = vadd.f32 %v3008_v55, %v2913_v23  ;;  %v3743_v57 = vsel %vm3742_vm9, %v3741_v19, 0 }
 0x4bf   : > { %v3010_v31 = vpop.f32.mrf.mxu0 }
 0x4c0   : > { %v3011_v13 = vadd.f32 %v3010_v31, %v2915_v47 }
 0x4c6   : > { %v3088_v10 = vpop.f32.mrf.mxu1  ;;  %v3168_v14 = vpop.f32.mrf.mxu0 }
 0x4c7   : > { %v3089_v20 = vadd.f32 %v3088_v10, %v3009_v40  ;;  %v3169_v49 = vadd.f32 %v3168_v14, %v2535_v51  ;;  %v6454_v14 = vand.u32 4294901760, %v3743_v57 }
 0x4c8   : > { %v3090_v21 = vpop.f32.mrf.mxu1  ;;  %v5097_v25 = vpop.f32.mrf.mxu0 }
 0x4c9   : > { %v3578_v1 = vmul.f32 0.4, %v3089_v20  ;;  %v3091_v52 = vadd.f32 %v3090_v21, %v3011_v13 }
 0x4cb   : > { %v3581_v11 = vmax.f32 %v3089_v20, %v3578_v1  ;;  %v3579_v4 = vmul.f32 0.4, %v3091_v52 }
 0x4cd   : > { %v3584_v27 = vadd.f32 %v3581_v11, %v6006_v37  ;;  %v3582_v35 = vmax.f32 %v3091_v52, %v3579_v4  ;;  %v6461_v52 = vsub.f32 %v3743_v57, %v6454_v14 }
 0x4cf   : > { %v6365_v63 = vsel %vm5766_vm7, %v3584_v27, 0.0  ;;  %v3259_v9 = vpop.f32.mrf.mxu1  ;;  %v3585_v37 = vadd.f32 %v3582_v35, %v6019_v46  ;;  %vm3720_vm7 = vcmp.lt.s32.totalorder %v5661_v7, 124 }
 0x4d0   : > { %3714 = vrot.lane.b32.xlu1 %v6365_v63, %s5439_s11  ;;  %3690 = vrot.lane.b32.xlu0 %v6365_v63, %s5436_s8  ;;  %v3260_v44 = vadd.f32 %v3259_v9, %v3169_v49 }
 0x4d1   : > { %v3339_v2 = vpop.f32.mrf.mxu0  ;;  %v5108_v53 = vpop.f32.mrf.mxu1  ;;  %v6382_v61 = vsel %vm5776_vm10, %v3585_v37, 0.0  ;;  %vm3596_vm10 = vcmp.lt.s32.totalorder %v5661_v7, 4 }
 0x4d2   : > { %v3340_v62 = vadd.f32 %v3339_v2, %v3260_v44 }
 0x4d3   : > { %v5119_v0 = vpop.f32.mrf.mxu0 }
 0x4d4   : > { %3681 = vrot.lane.b32.xlu1 %v6365_v63, %s5433_s7  ;;  %3657 = vrot.lane.b32.xlu0 %v6365_v63, %s5428_s5  ;;  %v3828_v0 = vand.u32 4294901760, %v6461_v52 }
 0x4d8   : > { %3600 = vrot.lane.b32.xlu1 %v6365_v63, %s5437_s0  ;;  %3633 = vrot.lane.b32.xlu0 %v6365_v63, %s5429_s25 }
 0x4d9   : > { %v3416_v17 = vpop.f32.mrf.mxu1 }
 0x4da   : > { %v3417_v46 = vadd.f32 %v3416_v17, %v3340_v62 }
 0x4db   : > { %v3499_v5 = vpop.f32.mrf.mxu0  ;;  %v5130_v6 = vpop.f32.mrf.mxu1 }
 0x4dc   : > { %3624 = vrot.lane.b32.xlu1 %v6365_v63, %s5434_s29  ;;  %3716 = vrot.lane.b32.xlu0 %v6382_v61, %s5439_s11  ;;  %v3500_v59 = vadd.f32 %v3499_v5, %v3417_v46 }
 0x4dd   : > { %v5141_v60 = vpop.f32.mrf.mxu0 }
 0x4e0   : > { %3590 = vrot.lane.b32.xlu1 %v6365_v63, %s5440_s12  ;;  %3659 = vrot.lane.b32.xlu0 %v6382_v61, %s5428_s5 }
 0x4e2   : > { %v3574_v16 = vpop.f32.mrf.mxu1 }
 0x4e3   : > { %v3575_v39 = vadd.f32 %v3574_v16, %v3500_v59 }
 0x4e4   : > { %v5152_v45 = vpop.f32.mrf.mxu1  ;;  %3692 = vrot.lane.b32.xlu1 %v6382_v61, %s5436_s8  ;;  %3683 = vrot.lane.b32.xlu0 %v6382_v61, %s5433_s7 }
 0x4e5   : > { %v3580_v30 = vmul.f32 0.4, %v3575_v39 }
 0x4e7   : > { %v3583_v48 = vmax.f32 %v3575_v39, %v3580_v30 }
 0x4e8   : > { %3635 = vrot.lane.b32.xlu1 %v6382_v61, %s5429_s25  ;;  %3602 = vrot.lane.b32.xlu0 %v6382_v61, %s5437_s0 }
 0x4e9   : > { %v3586_v54 = vadd.f32 %v3583_v48, %v6036_v50  ;;  %v6425_v50 = vld [vmem:[%s6725_s3] sm:$0xf] }
 0x4eb   : > { %v6402_v58 = vsel %vm5797_vm13, %v3586_v54, 0.0 }
 0x4ec   : > { %3694 = vrot.lane.b32.xlu1 %v6402_v58, %s5436_s8  ;;  %3626 = vrot.lane.b32.xlu0 %v6382_v61, %s5434_s29 }
 0x4f0   : > { %3718 = vrot.lane.b32.xlu1 %v6402_v58, %s5439_s11  ;;  %3637 = vrot.lane.b32.xlu0 %v6402_v58, %s5429_s25 }
 0x4f4   : > { %3661 = vrot.lane.b32.xlu1 %v6402_v58, %s5428_s5  ;;  %3628 = vrot.lane.b32.xlu0 %v6402_v58, %s5434_s29 }
 0x4f8   : > { %3685 = vrot.lane.b32.xlu1 %v6402_v58, %s5433_s7  ;;  %3592 = vrot.lane.b32.xlu0 %v6382_v61, %s5440_s12  ;;  %s5355_s7 = sshll.u32 %s5443_s30, 4  ;;  %s5356_s7 = int_to_ptr.vmem [resolvable:$false] %s5355_s7 }
 0x4f9   : > { %s5357_s19 = scalar_lea.vmem %s5356_s7, 32  ;;  %p5358_p0 = scmp.lt.s32.totalorder %s4791_s14, %s5356_s7 }
 0x4fa   : > { %p5359_p6 = scmp.lt.s32.totalorder %s5357_s19, %s5351_s22 }
 0x4fc   : > { %3604 = vrot.lane.b32.xlu1 %v6402_v58, %s5437_s0  ;;  %3738 = vperm.xlu0 %5263, %v6425_v50   ;;  %p5360_p11 = por %p5359_p6, %p5358_p0 }
 0x4fe   : > { %p5361_p13 = pnand %p5360_p11, %p5354_p9 }
 0x500   : > { %3594 = vrot.lane.b32.xlu1 %v6402_v58, %s5440_s12 }
 0x542   : > { %v3715_v18 = vpop.permute.xlu1 %3714  ;;  %v3691_v33 = vpop.permute.xlu0 %3690 }
 0x546   : > { %v6428_v22 = vpop.permute.xlu1 %3681  ;;  %v3658_v24 = vpop.permute.xlu0 %3657 }
 0x54a   : > { %v6430_v42 = vpop.permute.xlu1 %3600  ;;  %v3634_v51 = vpop.permute.xlu0 %3633 }
 0x54e   : > { %v3625_v26 = vpop.permute.xlu1 %3624  ;;  %v3717_v28 = vpop.permute.xlu0 %3716 }
 0x54f   : > { %v3722_v29 = vsel %vm3720_vm7, %v3715_v18, %v3717_v28 }
 0x550   : > { %3724 = vst [vmem:[#allocation2 + $0x60] sm:$0xf] %v3722_v29 }
 0x552   : > { %v6435_v32 = vpop.permute.xlu1 %3590  ;;  %v3660_v8 = vpop.permute.xlu0 %3659 }
 0x553   : > { %v3664_v34 = vsel %vm320_vm1, %v3658_v24, %v3660_v8 }
 0x554   : > { %v3669_v36 = vrot.slane %v3664_v34, 4 }
 0x556   : > { %v3675_v38 = vsel %vm307_vm3, %v6365_v63, %v3669_v36  ;;  %v3693_v41 = vpop.permute.xlu1 %3692  ;;  %v6443_v43 = vpop.permute.xlu0 %3683 }
 0x557   : > { %3678 = vst [vmem:[#allocation2 + $0x8] sm:$0xff] %v3675_v38  ;;  %v3697_v55 = vsel %vm2514_vm5, %v3691_v33, %v3693_v41  ;;  %v3688_v56 = vsel %vm1383_vm14, %v6428_v22, %v6443_v43  ;;  %v3735_v10 = vld [vmem:[#allocation2 + $0x60] sm:$0xf]  ;;  %v6465_v63 = vand.u32 4294901760, %v3675_v38 }
 0x558   : > { %v3702_v23 = vrot.slane %v3697_v55, 4  ;;  %v3746_v13 = vsel %vm307_vm3, %v3735_v10, 0 }
 0x559   : > { %v6463_v27 = vand.u32 4294901760, %v3746_v13  ;;  %v6484_v17 = vsub.f32 %v3675_v38, %v6465_v63 }
 0x55a   : > { %v3708_v12 = vsel %vm307_vm3, %v3688_v56, %v3702_v23  ;;  %v3636_v31 = vpop.permute.xlu1 %3635  ;;  %v3603_v47 = vpop.permute.xlu0 %3602 }
 0x55b   : > { %3711 = vst [vmem:[#allocation2 + $0x20] sm:$0xff] %v3708_v12  ;;  %v3640_v40 = vsel %vm294_vm2, %v3634_v51, %v3636_v31  ;;  %v3607_v49 = vsel %vm2423_vm8, %v6430_v42, %v3603_v47  ;;  %v6479_v37 = vsub.f32 %v3746_v13, %v6463_v27  ;;  %v6481_v44 = vand.u32 4294901760, %v3708_v12 }
 0x55c   : > { %v3646_v20 = vrot.slane %v3640_v40, 4 }
 0x55d   : > { %v6501_v29 = vsub.f32 %v3708_v12, %v6481_v44  ;;  %v3866_v10 = vand.u32 4294901760, %v6479_v37 }
 0x55e   : > { %v3695_v21 = vpop.permute.xlu1 %3694  ;;  %v3627_v25 = vpop.permute.xlu0 %3626 }
 0x55f   : > { %v3631_v1 = vsel %vm1325_vm0, %v3625_v26, %v3627_v25  ;;  %v3696_v62 = vsel %vm2514_vm5, %v3693_v41, %v3695_v21  ;;  %v3698_v5 = vsel %vm2514_vm5, %v3695_v21, %v3691_v33  ;;  %v3613_v33 = vrot.slane %v3607_v49, 4 }
 0x560   : > { %v3652_v11 = vsel %vm307_vm3, %v3631_v1, %v3646_v20 }
 0x561   : > { %3655 = vst [vmem:[#allocation2 + $0x50] sm:$0xff] %v3652_v11  ;;  %v6507_v36 = vand.u32 4294901760, %v3652_v11 }
 0x562   : > { %v3719_v4 = vpop.permute.xlu1 %3718  ;;  %v3638_v9 = vpop.permute.xlu0 %3637 }
 0x563   : > { %v3721_v2 = vsel %vm3720_vm7, %v3717_v28, %v3719_v4  ;;  %v3639_v53 = vsel %vm294_vm2, %v3636_v31, %v3638_v9  ;;  %v3641_v35 = vsel %vm294_vm2, %v3638_v9, %v3634_v51  ;;  %v3703_v51 = vrot.slane %v3696_v62, 4 }
 0x564   : > { %3725 = vst [vmem:[#allocation2 + $0x70] sm:$0xf] %v3721_v2  ;;  %v3645_v6 = vrot.slane %v3641_v35, 4  ;;  %v3647_v46 = vrot.slane %v3639_v53, 4  ;;  %v3704_v28 = vrot.slane %v3698_v5, 4  ;;  %v6537_v21 = vsub.f32 %v3652_v11, %v6507_v36 }
 0x565   : > { %v3878_v11 = vand.u32 4294901760, %v6501_v29  ;;  %v3829_v9 = vsub.f32 %v6461_v52, %v3828_v0 }
 0x566   : > { %v3662_v60 = vpop.permute.xlu1 %3661  ;;  %v3629_v59 = vpop.permute.xlu0 %3628 }
 0x567   : > { %v3663_v16 = vsel %vm320_vm1, %v3660_v8, %v3662_v60  ;;  %v3665_v39 = vsel %vm320_vm1, %v3662_v60, %v3658_v24  ;;  %v3630_v45 = vsel %vm1325_vm0, %v3627_v25, %v3629_v59  ;;  %v3632_v30 = vsel %vm1325_vm0, %v3629_v59, %v3625_v26 }
 0x568   : > { %v3670_v48 = vrot.slane %v3663_v16, 4  ;;  %v3671_v54 = vrot.slane %v3665_v39, 4  ;;  %v3651_v15 = vsel %vm307_vm3, %v3632_v30, %v3645_v6  ;;  %v3653_v18 = vsel %vm307_vm3, %v3630_v45, %v3647_v46 }
 0x569   : > { %3654 = vst [vmem:[#allocation2 + $0x18] sm:$0xff] %v3651_v15  ;;  %3656 = vst [vmem:[#allocation2 + $0x68] sm:$0xff] %v3653_v18  ;;  %v6509_v19 = vand.u32 4294901760, %v3651_v15  ;;  %v3867_v6 = vsub.f32 %v6479_v37, %v3866_v10  ;;  %v3896_v46 = vand.u32 4294901760, %v6537_v21  ;;  %v3879_v45 = vsub.f32 %v6501_v29, %v3878_v11 }
 0x56a   : > { %v3676_v24 = vsel %vm307_vm3, %v6382_v61, %v3670_v48  ;;  %v3677_v26 = vsel %vm307_vm3, %v6402_v58, %v3671_v54  ;;  %v3686_v8 = vpop.permute.xlu1 %3685  ;;  %v3593_v34 = vpop.permute.xlu0 %3592  ;;  %v3830_v18 = vand.u32 4294901760, %v3829_v9  ;;  %vm4321_vm1 = vcmask 31744  }
 0x56b   : > { %3679 = vst [vmem:[#allocation2 + $0x48] sm:$0xff] %v3676_v24  ;;  %3680 = vst [vmem:[#allocation2 + $0x40] sm:$0xff] %v3677_v26  ;;  %v3687_v38 = vsel %vm1383_vm14, %v6443_v43, %v3686_v8  ;;  %v3689_v41 = vsel %vm1383_vm14, %v3686_v8, %v6428_v22  ;;  %v3598_v58 = vsel %vm3596_vm10, %v6435_v32, %v3593_v34  ;;  %v3736_v55 = vld [vmem:[#allocation2 + $0x70] sm:$0xf]  ;;  %v6520_v23 = vand.u32 4294901760, %v3676_v24 }
 0x56c   : > { %v3709_v56 = vsel %vm307_vm3, %v3687_v38, %v3703_v51  ;;  %v3710_v57 = vsel %vm307_vm3, %v3689_v41, %v3704_v28  ;;  %v3619_v12 = vsel %vm307_vm3, %v3598_v58, %v3613_v33  ;;  %v3749_v31 = vsel %vm307_vm3, %v3736_v55, 0 }
 0x56d   : > { %3712 = vst [vmem:[#allocation2 + $0x10] sm:$0xff] %v3709_v56  ;;  %3713 = vst [vmem:[#allocation2 + $0x38] sm:$0xff] %v3710_v57  ;;  %v6526_v43 = vand.u32 4294901760, %v3749_v31  ;;  %v6528_v22 = vand.u32 4294901760, %v3709_v56  ;;  %v6530_v47 = vand.u32 4294901760, %v3619_v12  ;;  %v6534_v20 = vsub.f32 %v3676_v24, %v6520_v23 }
 0x56e   : > { %v3605_v40 = vpop.permute.xlu1 %3604  ;;  %v6551_v4 = vsub.f32 %v3651_v15, %v6509_v19  ;;  %v3868_v15 = vand.u32 4294901760, %v3867_v6  ;;  %v3897_v24 = vsub.f32 %v6537_v21, %v3896_v46  ;;  %v3880_v26 = vand.u32 4294901760, %v3879_v45 }
 0x56f   : > { %v3608_v25 = vsel %vm2423_vm8, %v3605_v40, %v6430_v42  ;;  %3774 = vmatprep.subr.mxu0 %v6526_v43  ;;  %v6544_v13 = vsub.f32 %v3749_v31, %v6526_v43  ;;  %v6547_v1 = vsub.f32 %v3709_v56, %v6528_v22  ;;  %v3890_v42 = vand.u32 4294901760, %v6484_v17 }
 0x570   : > { %3776 = vmatpush1.msra.mxu0 %v6463_v27  ;;  %v3884_v35 = vand.u32 4294901760, %v6534_v20  ;;  %v6563_v49 = vsub.f32 %v3619_v12, %v6530_v47  ;;  %v3612_v62 = vrot.slane %v3608_v25, 4  ;;  %v3902_v7 = vand.u32 4294901760, %v6551_v4 }
 0x571   : > { %3778 = vmatprep.subr.mxu0 %v6528_v22  ;;  %v3860_v2 = vand.u32 4294901760, %v6544_v13  ;;  %v3872_v53 = vand.u32 4294901760, %v6547_v1  ;;  %v3891_v33 = vsub.f32 %v6484_v17, %v3890_v42  ;;  %v3898_v55 = vand.u32 4294901760, %v3897_v24 }
 0x572   : > { %v3595_v5 = vpop.permute.xlu1 %3594  ;;  %3780 = vmatpush1.msra.mxu0 %v6481_v44  ;;  %v3885_v48 = vsub.f32 %v6534_v20, %v3884_v35  ;;  %v3908_v54 = vand.u32 4294901760, %v6563_v49  ;;  %v3903_v8 = vsub.f32 %v6551_v4, %v3902_v7 }
 0x573   : > { %v3599_v60 = vsel %vm3596_vm10, %v3595_v5, %v6435_v32  ;;  %v3861_v59 = vsub.f32 %v6544_v13, %v3860_v2  ;;  %3782 = vmatprep.subr.mxu0 %v6520_v23  ;;  %v3873_v16 = vsub.f32 %v6547_v1, %v3872_v53  ;;  %v3892_v58 = vand.u32 4294901760, %v3891_v33 }
 0x574   : > { %v3618_v39 = vsel %vm307_vm3, %v3599_v60, %v3612_v62  ;;  %3784 = vmatpush1.msra.mxu0 %v6465_v63  ;;  %v3886_v34 = vand.u32 4294901760, %v3885_v48  ;;  %v3909_v38 = vsub.f32 %v6563_v49, %v3908_v54  ;;  %v3904_v57 = vand.u32 4294901760, %v3903_v8 }
 0x575   : > { %v3862_v32 = vand.u32 4294901760, %v3861_v59  ;;  %3786 = vmatprep.subr.mxu0 %v6507_v36  ;;  %v6587_v30 = vand.u32 4294901760, %v3618_v39  ;;  %v3874_v28 = vand.u32 4294901760, %v3873_v16 }
 0x576   : > { %3788 = vmatpush1.msra.mxu0 %v6509_v19  ;;  %v3910_v12 = vand.u32 4294901760, %v3909_v38 }
 0x577   : > { %3863 = vmatprep.subr.mxu1 %v3862_v32  ;;  %3790 = vmatprep.subr.mxu0 %v6530_v47  ;;  %v3913_v51 = vsub.f32 %v3618_v39, %v6587_v30 }
 0x578   : > { %3869 = vmatpush1.msra.mxu1 %v3868_v15  ;;  %3792 = vmatpush1.msra.mxu0 %v6587_v30 }
 0x579   : > { %3875 = vmatprep.subr.mxu1 %v3874_v28  ;;  %3981 = vmatprep.subr.mxu0 %v6544_v13  ;;  %v3914_v41 = vand.u32 4294901760, %v3913_v51 }
 0x57a   : > { %3881 = vmatpush1.msra.mxu1 %v3880_v26  ;;  %3831 = vmatmul.mubr.f32.vlgmr.msra.gmra.mxu0 %v3830_v18 }
 0x57b   : > { %3887 = vmatprep.subr.mxu1 %v3886_v34  ;;  %3984 = vmatpush1.msra.mxu0 %v6479_v37  ;;  %v3915_v56 = vsub.f32 %v3913_v51, %v3914_v41 }
 0x57c   : > { %3893 = vmatpush1.msra.mxu1 %v3892_v58  ;;  %3987 = vmatprep.subr.mxu0 %v6547_v1 }
 0x57d   : > { %3899 = vmatprep.subr.mxu1 %v3898_v55  ;;  %3990 = vmatpush1.msra.mxu0 %v6501_v29  ;;  %v3916_v31 = vand.u32 4294901760, %v3915_v56 }
 0x57e   : > { %3905 = vmatpush1.msra.mxu1 %v3904_v57  ;;  %3993 = vmatprep.subr.mxu0 %v6534_v20 }
 0x57f   : > { %3911 = vmatprep.subr.mxu1 %v3910_v12  ;;  %3996 = vmatpush1.msra.mxu0 %v6484_v17 }
 0x580   : > { %3999 = vmatprep.subr.mxu0 %v6537_v21  ;;  %3917 = vmatpush1.msra.mxu1 %v3916_v31 }
 0x581   : > { %4002 = vmatpush1.msra.mxu0 %v6551_v4  ;;  %3952 = vmatmul.mubr.f32.vlgmr.msra.gmra.mxu1 %v6454_v14 }
 0x582   : > { %4005 = vmatprep.subr.mxu0 %v6563_v49  ;;  %4072 = vmatprep.subr.mxu1 %v6526_v43 }
 0x583   : > { %4008 = vmatpush1.msra.mxu0 %v3913_v51  ;;  %4041 = vmatprep.mubr.f32.mxu0 %v5430_v3 }
 0x584   : > { %4074 = vmatpush1.msra.mxu1 %v6463_v27  ;;  %4044 = vmatmul.mubr.f32.vlgmr.msra.gmra.mxu0 %v6461_v52  ;;  %v5442_v52 = vmov 4  }
 0x585   : > { %4076 = vmatprep.subr.mxu1 %v6528_v22  ;;  %4157 = vmatprep.subr.mxu0 %v3860_v2 }
 0x586   : > { %4078 = vmatpush1.msra.mxu1 %v6481_v44  ;;  %4161 = vmatpush1.msra.mxu0 %v3866_v10 }
 0x587   : > { %4080 = vmatprep.subr.mxu1 %v6520_v23  ;;  %4165 = vmatprep.subr.mxu0 %v3872_v53 }
 0x588   : > { %4082 = vmatpush1.msra.mxu1 %v6465_v63  ;;  %4169 = vmatpush1.msra.mxu0 %v3878_v11 }
 0x589   : > { %4084 = vmatprep.subr.mxu1 %v6507_v36  ;;  %4173 = vmatprep.subr.mxu0 %v3884_v35 }
 0x58a   : > { %4086 = vmatpush1.msra.mxu1 %v6509_v19  ;;  %4177 = vmatpush1.msra.mxu0 %v3890_v42 }
 0x58b   : > { %4088 = vmatprep.subr.mxu1 %v6530_v47  ;;  %4181 = vmatprep.subr.mxu0 %v3896_v46 }
 0x58c   : > { %4090 = vmatpush1.msra.mxu1 %v6587_v30  ;;  %4123 = vmatprep.mubr.f32.mxu1 %v5430_v3 }
 0x58d   : > { %4185 = vmatpush1.msra.mxu0 %v3902_v7  ;;  %4127 = vmatmul.mubr.f32.vlgmr.msra.gmra.mxu1 %v3828_v0 }
 0x58e   : > { %4189 = vmatprep.subr.mxu0 %v3908_v54  ;;  %4256 = vmatprep.subr.mxu1 %v6526_v43 }
 0x58f   : > { %4193 = vmatpush1.msra.mxu0 %v3914_v41  ;;  %4226 = vmatprep.mubr.f32.mxu0 %v5430_v3 }
 0x590   : > { %4258 = vmatpush1.msra.mxu1 %v6463_v27  ;;  %4228 = vmatmul.mubr.f32.vlgmr.msra.gmra.mxu0 %v6454_v14 }
 0x591   : > { %4260 = vmatprep.subr.mxu1 %v6528_v22  ;;  %4307 = vmatprep.mubr.f32.mxu1 %v5430_v3 }
 0x592   : > { %4262 = vmatpush1.msra.mxu1 %v6481_v44  ;;  %5153 = vmatprep.subr.mxu0 %v5430_v3  ;;  %v3739_v44 = vpop.permute.xlu0 %3738 }
 0x593   : > { %4264 = vmatprep.subr.mxu1 %v6520_v23  ;;  %5155 = vmatprep.mubr.msk.f32.mxu0 %vm5432_vm4, %v5430_v3 }
 0x594   : > { %4266 = vmatpush1.msra.mxu1 %v6465_v63  ;;  %5264 = vset.pattern.permute.xlu1 %v5442_v52 }
 0x595   : > { %4268 = vmatprep.subr.mxu1 %v6507_v36  ;;  %5265 = vset.pattern.permute.xlu0 %v5442_v52 }
 0x596   : > { %4270 = vmatpush1.msra.mxu1 %v6509_v19  ;;  %4318 = vperm.xlu1 %5264, %v6425_v50  }
 0x597   : > { %4272 = vmatprep.subr.mxu1 %v6530_v47 }
 0x598   : > { %4274 = vmatpush1.msra.mxu1 %v6587_v30 }
 0x599   : > { %4309 = vmatmul.mubr.f32.vlgmr.msra.gmra.mxu1 %v6454_v14  ;;  %5158 = vmatprep.subr.mxu1 %v5430_v3  ;;  %v286_v14 = vld [vmem:[#allocation8 + $0x10] sm:$0xf] }
 0x59a   : > { %5160 = vmatprep.mubr.msk.f32.mxu1 %vm5432_vm4, %v5430_v3  ;;  %v4323_v22 = vsel %vm4321_vm1, %v286_v14, 0 }
 0x59b   : > { %v4394_v10 = vand.u32 4294901760, %v4323_v22 }
 0x59d   : > { %v4395_v50 = vsub.f32 %v4323_v22, %v4394_v10 }
 0x59f   : > { %v4396_v11 = vand.u32 4294901760, %v4395_v50 }
 0x5a1   : > { %v4397_v2 = vsub.f32 %v4395_v50, %v4396_v11 }
 0x5a3   : > { %v4398_v49 = vand.u32 4294901760, %v4397_v2 }
 0x611   : > { %v4319_v59 = vpop.permute.xlu1 %4318 }
 0x63a   : > { %v3832_v27 = vpop.f32.mrf.mxu0 }
 0x63c   : > { %v3833_v63 = vpop.f32.mrf.mxu0 }
 0x63d   : > { %v3834_v29 = vadd.f32 %v3833_v63, %v3739_v44 }
 0x641   : > { %v3953_v0 = vpop.f32.mrf.mxu1 }
 0x643   : > { %v3954_v17 = vpop.f32.mrf.mxu1 }
 0x644   : > { %v4045_v37 = vpop.f32.mrf.mxu0  ;;  %v3955_v23 = vadd.f32 %v3954_v17, %v3834_v29 }
 0x646   : > { %v4046_v19 = vpop.f32.mrf.mxu0 }
 0x647   : > { %v4047_v40 = vadd.f32 %v4046_v19, %v3955_v23 }
 0x64d   : > { %v4128_v36 = vpop.f32.mrf.mxu1 }
 0x64f   : > { %v4129_v47 = vpop.f32.mrf.mxu1 }
 0x650   : > { %v4229_v43 = vpop.f32.mrf.mxu0  ;;  %v4130_v20 = vadd.f32 %v4129_v47, %v4047_v40 }
 0x652   : > { %v4230_v21 = vpop.f32.mrf.mxu0 }
 0x653   : > { %v4231_v13 = vadd.f32 %v4230_v21, %v4130_v20 }
 0x659   : > { %v4310_v25 = vpop.f32.mrf.mxu1 }
 0x65b   : > { %v4311_v1 = vpop.f32.mrf.mxu1 }
 0x65c   : > { %v4312_v4 = vadd.f32 %v4311_v1, %v4231_v13 }
 0x65e   : > { %v4314_v9 = vmul.f32 0.4, %v4312_v4 }
 0x660   : > { %v4315_v42 = vmax.f32 %v4312_v4, %v4314_v9 }
 0x662   : > { %v4316_v53 = vadd.f32 %v4315_v42, %v6382_v61 }
 0x664   : > { %v4326_v35 = vsel %vm307_vm3, %v4316_v53, 0 }
 0x665   : > { %v4359_v62 = vand.u32 4294901760, %v4326_v35 }
 0x667   : > { %5154 = vmatpush3.msra.mxu0 %v4359_v62  ;;  %v4436_v5 = vsub.f32 %v4326_v35, %v4359_v62 }
 0x668   : > { %5156 = vmatmul.mubr.f32.vlgmr.msra.gmra.mxu0 %v4398_v49  ;;  %5163 = vmatprep.subr.mxu0 %v5430_v3 }
 0x669   : > { %5164 = vmatpush3.msra.mxu0 %v4436_v5  ;;  %5165 = vmatprep.mubr.msk.f32.mxu0 %vm5432_vm4, %v5430_v3  ;;  %v4437_v6 = vand.u32 4294901760, %v4436_v5 }
 0x66a   : > { %5173 = vmatprep.subr.mxu0 %v5430_v3 }
 0x66b   : > { %v4438_v46 = vsub.f32 %v4436_v5, %v4437_v6 }
 0x66c   : > { %5166 = vmatmul.mubr.f32.vlgmr.msra.gmra.mxu0 %v4395_v50 }
 0x66d   : > { %5174 = vmatpush3.msra.mxu0 %v4437_v6  ;;  %v4439_v61 = vand.u32 4294901760, %v4438_v46  ;;  %5175 = vmatprep.mubr.msk.f32.mxu0 %vm5432_vm4, %v5430_v3 }
 0x66f   : > { %5159 = vmatpush3.msra.mxu1 %v4439_v61 }
 0x670   : > { %5161 = vmatmul.mubr.f32.vlgmr.msra.gmra.mxu1 %v4394_v10  ;;  %5168 = vmatprep.subr.mxu1 %v5430_v3 }
 0x671   : > { %5169 = vmatpush3.msra.mxu1 %v4359_v62  ;;  %5170 = vmatprep.mubr.msk.f32.mxu1 %vm5432_vm4, %v5430_v3 }
 0x672   : > { %5178 = vmatprep.subr.mxu1 %v5430_v3  ;;  %5176 = vmatmul.mubr.f32.vlgmr.msra.gmra.mxu0 %v4394_v10 }
 0x674   : > { %5171 = vmatmul.mubr.f32.vlgmr.msra.gmra.mxu1 %v4396_v11 }
 0x675   : > { %5179 = vmatpush3.msra.mxu1 %v4359_v62  ;;  %5180 = vmatprep.mubr.msk.f32.mxu1 %vm5432_vm4, %v5430_v3 }
 0x678   : > { %5181 = vmatmul.mubr.f32.vlgmr.msra.gmra.mxu1 %v4394_v10 }
 0x728   : > { %v4400_v60 = vpop.f32.mrf.mxu0 }
 0x729   : > { %v4401_v45 = vadd.f32 %v4400_v60, %v4319_v59 }
 0x72a   : > { %v5157_v16 = vpop.f32.mrf.mxu0 }
 0x72c   : > { %v4550_v39 = vpop.f32.mrf.mxu0 }
 0x72e   : > { %v5167_v7 = vpop.f32.mrf.mxu0 }
 0x730   : > { %v4476_v32 = vpop.f32.mrf.mxu1 }
 0x731   : > { %v4477_v30 = vadd.f32 %v4476_v32, %v4401_v45 }
 0x732   : > { %v5162_v48 = vpop.f32.mrf.mxu1  ;;  %v4698_v54 = vpop.f32.mrf.mxu0 }
 0x733   : > { %v4551_v15 = vadd.f32 %v4550_v39, %v4477_v30 }
 0x734   : > { %v4624_v18 = vpop.f32.mrf.mxu1  ;;  %v5177_v33 = vpop.f32.mrf.mxu0 }
 0x735   : > { %v4625_v51 = vadd.f32 %v4624_v18, %v4551_v15 }
 0x736   : > { %v5172_v28 = vpop.f32.mrf.mxu1 }
 0x737   : > { %v4699_v3 = vadd.f32 %v4698_v54, %v4625_v51 }
 0x738   : > { %v4770_v24 = vpop.f32.mrf.mxu1 }
 0x739   : > { %v4771_v26 = vadd.f32 %v4770_v24, %v4699_v3 }
 0x73a   : > { %v5182_v8 = vpop.f32.mrf.mxu1 }
 0x73b   : > { %v4774_v34 = vmul.f32 0.4, %v4771_v26 }
 0x73d   : > { %v4775_v38 = vmax.f32 %v4771_v26, %v4774_v34 }
 0x73f   : > { %4776 = vst [vmem:[%s261_s10] sm:$0x1] %v4775_v38 }
 0x740   : > { %5364 = shalt.err (!%p5361_p13)
}
 0x741   : > { %s5365_s29 = scalar_lea.hbm %s4788_s9, 16  ;;  %s5369_s0 = scalar_lea.hbm %s6726_s4, 48 }
 0x742   : > { %p5366_p12 = scmp.ne.s32.totalorder %s4788_s9, %s5365_s29  ;;  %p5370_p10 = scmp.lt.s32.totalorder %s4788_s9, %s6726_s4 }
 0x743   : > { %p5371_p3 = scmp.lt.s32.totalorder %s5369_s0, %s5365_s29 }
 0x744   : > { %p5367_p1 = pnand %p5366_p12, %p6750_p7 }
 0x745   : > { %p5372_p5 = por %p5371_p3, %p5370_p10 }
 0x746   : > { %p5368_p2 = pneg %p5367_p1 }
 0x748   : > { %p5373_p4 = pnand %p5372_p5, %p5368_p2 }
 0x74a   : > { %5376 = shalt.err (!%p5373_p4)
}
 0x74b   : > { %5191 = dma.vmem_to_hbm [thread:$0]  (%p6750_p7), %s4791_s14, 16, %s4788_s9, %s4778_s13  }
 0x74c PF: > { %p5211_p8 = scmp.ge.s32.totalorder %s5423_s18, 2  ;;  %s4802_s20 = sand.u32 1, %s5411_s15  }
 0x74d   : > { %p6751_p9 = scmp.ne.s32.totalorder %s6734_s27, 0  ;;  %s4803_s23 = scalar_lea.sflag [#allocation5], %s4802_s20 }
 0x74f   : > { %p5205_p0 = pnand %p5211_p8, %p6751_p9 }
 0x751   : > { %p5206_p6 = pneg %p5205_p0 }
 0x753   : > { %5406 = dma.done.wait (%p5206_p6), %s4803_s23, 16  }
 0x754   : > { %5408 = vsyncadd (%p5206_p6), %s4803_s23, 4294967280  ;;  %p20_p11 = scmp.ge.s32.totalorder %s5494_s21, 5   ;;  %s6752_s15 = smov %s5415_s16 }
 0x755   : > { %s6753_s16 = smov %s5419_s17  ;;  %s6754_s17 = smov %s5506_s24 }
 0x756   : > { %s6755_s18 = smov %s5494_s21  ;;  %22 = sbr.rel (!%p20_p11) target bundleno = 9 (0x9), region = 98 }
 0x75b   :  { %4807 = vsyncpa [#allocation4], 1 }
 0x75c   :  { %4809 = vsyncpa [#allocation4 + $0x1], 1 }
 0x75d   :  { %4810 = vsyncpa [#allocation7], 1 }
 0x75e   :  { %4812 = vsyncpa [#allocation7 + $0x1], 1 }
 0x75f   :  { %4813 = vsyncpa [#allocation5], 1 }
 0x760   :  { %4815 = vsyncpa [#allocation5 + $0x1], 1 }

</bundles_post_ra>
